<compile_context>
chip_gen: v7x
topology: tpu7x:2x2x1
jax: 0.10.0
libtpu: 0.0.40
codegen_flags: <defaults>
</compile_context>

<pallas_src>
import functools

import jax
import jax.numpy as jnp
from jax.experimental import pallas as pl
from jax.experimental.pallas import tpu as pltpu

LANE = 128
SUBLANE_BF16 = 16   # bf16 vregs pack 16 sublanes; also a multiple of 8 (f32)


def _round_up(x, m):
    return ((x + m - 1) // m) * m


def _hardswish(x):
    # torch.nn.Hardswish: x * relu6(x + 3) / 6
    return x * jnp.clip(x + 3.0, 0.0, 6.0) * (1.0 / 6.0)


def _interspg_actor_kernel(lay_pad, compute_dtype,
                           s_ref,
                           we1_ref, be1_ref, we2_ref, be2_ref,
                           wd1_ref, bd1_ref, wd2_ref, bd2_ref,
                           wa1_ref, ba1_ref, wa2_ref, ba2_ref,
                           o_ref, xcat_ref):
    """Fused enc_s -> DenseNet -> dec_a -> tanh for one batch tile."""

    def mm(a_c, w_ref):
        # MXU matmul: compute_dtype operands, f32 accumulation.
        return jnp.dot(a_c, w_ref[...], preferred_element_type=jnp.float32)

    # enc_s: Linear -> ReLU -> Linear  (epilogues in f32, one cast per reuse)
    s_c = s_ref[...].astype(compute_dtype)
    h0 = jnp.maximum(mm(s_c, we1_ref) + be1_ref[...], 0.0)              # [TB, M_pad]
    x1 = mm(h0.astype(compute_dtype), we2_ref) + be2_ref[...]           # [TB, L_pad]
    x1_c = x1.astype(compute_dtype)
    xcat_ref[:, :lay_pad] = x1_c                                         # packed x3

    # DenseNet.dense1
    h1 = _hardswish(mm(x1_c, wd1_ref) + bd1_ref[...])                   # [TB, L_pad]
    xcat_ref[:, lay_pad:2 * lay_pad] = h1.astype(compute_dtype)

    # DenseNet.dense2: ONE K=2*L_pad matmul against the packed [x1 | h1] slab
    h2 = _hardswish(mm(xcat_ref[:, :2 * lay_pad], wd2_ref) + bd2_ref[...])
    xcat_ref[:, 2 * lay_pad:] = h2.astype(compute_dtype)                 # [TB, 2L_pad]

    # dec_a: ONE K=4*L_pad matmul against packed [x1 | h1 | h2], ReLU, Linear, tanh
    g = jnp.maximum(mm(xcat_ref[...], wa1_ref) + ba1_ref[...], 0.0)     # [TB, M_pad]
    a = jnp.tanh(mm(g.astype(compute_dtype), wa2_ref) + ba2_ref[...])   # [TB, A_pad]
    o_ref[...] = a.astype(o_ref.dtype)                                  # lane-dense


def interspg_forward(state, params, *, compute_dtype=jnp.bfloat16, batch_tile=256):
    """InterSPG.forward: tanh(dec_a(DenseNet(enc_s(state)))). Returns [B, action_dim]."""
    (we1, be1), (we2, be2), (wd1, bd1), (wd2, bd2), (wa1, ba1), (wa2, ba2) = params

    B, S = state.shape
    M = we1.shape[1]          # mid_dim
    L = we2.shape[1]          # lay_dim = mid_dim // 2
    A = wa2.shape[1]          # action_dim
    assert M == 2 * L and wd2.shape == (2 * L, 2 * L) and wa1.shape == (4 * L, M)

    L_pad = _round_up(L, LANE)
    M_pad = _round_up(M, LANE)
    A_pad = _round_up(A, LANE)

    def pad2(w, r, c):
        return jnp.zeros((r, c), jnp.float32).at[:w.shape[0], :w.shape[1]].set(w)

    # Lane-pad every feature dim; scatter wd2 / wa1 rows to match the packed
    # [x1 | h1 | h2] activation layout (zero weight rows meet zero pad lanes).
    we1_p, be1_p = pad2(we1, S, M_pad), pad2(be1, 1, M_pad)
    we2_p, be2_p = pad2(we2, M_pad, L_pad), pad2(be2, 1, L_pad)
    wd1_p, bd1_p = pad2(wd1, L_pad, L_pad), pad2(bd1, 1, L_pad)

    wd2_p = jnp.zeros((2 * L_pad, 2 * L_pad), jnp.float32)
    wd2_p = wd2_p.at[:L, :2 * L].set(wd2[:L])
    wd2_p = wd2_p.at[L_pad:L_pad + L, :2 * L].set(wd2[L:])
    bd2_p = pad2(bd2, 1, 2 * L_pad)

    wa1_p = jnp.zeros((4 * L_pad, M_pad), jnp.float32)
    wa1_p = wa1_p.at[:L, :M].set(wa1[:L])
    wa1_p = wa1_p.at[L_pad:L_pad + L, :M].set(wa1[L:2 * L])
    wa1_p = wa1_p.at[2 * L_pad:2 * L_pad + 2 * L, :M].set(wa1[2 * L:])
    ba1_p = pad2(ba1, 1, M_pad)

    wa2_p, ba2_p = pad2(wa2, M_pad, A_pad), pad2(ba2, 1, A_pad)

    mats = [we1_p, we2_p, wd1_p, wd2_p, wa1_p, wa2_p]
    if compute_dtype != jnp.float32:
        mats = [m.astype(compute_dtype) for m in mats]   # halve weight DMA / VMEM
    we1_p, we2_p, wd1_p, wd2_p, wa1_p, wa2_p = mats
    # Biases stay f32: they feed f32 epilogues directly.

    # Batch tiling: 16-sublane multiples, >=2 grid steps when the batch allows
    # (so v7x can shard over both TensorCores), no wrapper-side batch padding —
    # a partial trailing block is handled by Pallas' masked boundary DMA.
    TB = min(_round_up(batch_tile, SUBLANE_BF16), _round_up(B, SUBLANE_BF16))
    if pl.cdiv(B, TB) < 2:
        TB = max(SUBLANE_BF16, _round_up(pl.cdiv(B, 2), SUBLANE_BF16))
    if TB >= B:
        TB = B                      # single full-batch block (legal full-dim spec)
    grid_steps = pl.cdiv(B, TB)

    kernel_args = (state,
                   we1_p, be1_p, we2_p, be2_p, wd1_p, bd1_p, wd2_p, bd2_p,
                   wa1_p, ba1_p, wa2_p, ba2_p)

    stream_spec = pl.BlockSpec((TB, S), lambda i: (i, 0))
    out_spec = pl.BlockSpec((TB, A_pad), lambda i: (i, 0))

    # Resident (weight / bias) operands: constant index_map, single-buffered.
    spec_variants = []
    try:
        spec_variants.append([
            pl.BlockSpec(a.shape, lambda i: (0, 0), pipeline_mode=pl.Buffered(1))
            for a in kernel_args[1:]])
    except Exception:
        pass
    spec_variants.append([pl.BlockSpec(a.shape, lambda i: (0, 0))
                          for a in kernel_args[1:]])     # fallback: default buffering

    # Explicit VMEM budget: single-buffered weights + biases, double-buffered
    # state/output tiles, packed-activation scratch, live f32 intermediates.
    csize = jnp.dtype(compute_dtype).itemsize
    resident_bytes = sum(a.size * a.dtype.itemsize for a in kernel_args[1:])
    io_bytes = 2 * TB * (S * state.dtype.itemsize + A_pad * 4)
    scratch_bytes = TB * 4 * L_pad * csize
    act_bytes = TB * (2 * M_pad + 4 * L_pad + A_pad) * 4
    needed = resident_bytes + io_bytes + scratch_bytes + act_bytes
    try:
        phys_vmem = pltpu.get_tpu_info().vmem_capacity_bytes
    except Exception:
        phys_vmem = 64 * 1024 * 1024          # smallest physical VMEM (v7x)
    vmem_limit = int(min(max(needed * 3 // 2 + (4 << 20), 32 << 20),
                         phys_vmem * 9 // 10))

    flops = 2 * B * (S * M_pad + M_pad * L_pad + L_pad * L_pad
                     + (2 * L_pad) * (2 * L_pad) + 4 * L_pad * M_pad
                     + M_pad * A_pad)
    cost = pl.CostEstimate(
        flops=flops, transcendentals=B * A_pad,
        bytes_accessed=resident_bytes + B * (S * state.dtype.itemsize + A_pad * 4))

    def build(resident_specs):
        return pl.pallas_call(
            functools.partial(_interspg_actor_kernel, L_pad, compute_dtype),
            out_shape=jax.ShapeDtypeStruct((B, A_pad), jnp.float32),
            grid_spec=pltpu.PrefetchScalarGridSpec(
                num_scalar_prefetch=0,
                grid=(grid_steps,),
                in_specs=[stream_spec] + resident_specs,
                out_specs=out_spec,
                scratch_shapes=[pltpu.VMEM((TB, 4 * L_pad), compute_dtype)],
            ),
            compiler_params=pltpu.CompilerParams(
                dimension_semantics=("parallel",),      # megacore batch sharding
                vmem_limit_bytes=vmem_limit),
            cost_estimate=cost,
        )

    out = None
    last_err = None
    for resident_specs in spec_variants:
        try:
            out = build(resident_specs)(*kernel_args)
            break
        except Exception as e:                # fall back to default buffering
            last_err = e
    if out is None:
        raise last_err

    return out[:, :A]


def init_params(key, state_dim, mid_dim, action_dim):
    """PyTorch-nn.Linear-style uniform init. Weights [in, out], biases [1, out]."""
    L = mid_dim // 2
    dims = [(state_dim, mid_dim), (mid_dim, L),        # enc_s
            (L, L),                                    # DenseNet.dense1
            (2 * L, 2 * L),                            # DenseNet.dense2
            (4 * L, mid_dim), (mid_dim, action_dim)]   # dec_a
    params = []
    for din, dout in dims:
        key, kw, kb = jax.random.split(key, 3)
        bound = 1.0 / jnp.sqrt(jnp.float32(din))
        w = jax.random.uniform(kw, (din, dout), jnp.float32, -bound, bound)
        b = jax.random.uniform(kb, (1, dout), jnp.float32, -bound, bound)
        params.append((w, b))
    return params


def reference_forward(state, params):
    """Pure-JAX reference matching the PyTorch InterSPG.forward structure."""
    (we1, be1), (we2, be2), (wd1, bd1), (wd2, bd2), (wa1, ba1), (wa2, ba2) = params
    h = jnp.maximum(state @ we1 + be1, 0.0)
    x1 = h @ we2 + be2
    d1 = _hardswish(x1 @ wd1 + bd1)
    x2 = jnp.concatenate([x1, d1], axis=1)
    d2 = _hardswish(x2 @ wd2 + bd2)
    x3 = jnp.concatenate([x2, d2], axis=1)
    g = jnp.maximum(x3 @ wa1 + ba1, 0.0)
    return jnp.tanh(g @ wa2 + ba2)


if __name__ == "__main__":
    batch = 2
    state_dim = 16
    mid_dim = 32        # lay_dim = 16, DenseNet out_dim = 64
    action_dim = 4

    key = jax.random.PRNGKey(0)
    key, kx = jax.random.split(key)
    state = jax.random.normal(kx, (batch, state_dim), jnp.float32)
    params = init_params(key, state_dim, mid_dim, action_dim)

    ref = reference_forward(state, params)

    # f32 MXU-operand path (tight check).
    a_f32 = jax.block_until_ready(
        interspg_forward(state, params, compute_dtype=jnp.float32))
    assert a_f32.shape == (batch, action_dim)
    assert jnp.allclose(a_f32, ref, atol=1e-4, rtol=1e-4)

    # Default bf16 MXU-operand path (f32 accumulation / f32 epilogues).
    a_bf16 = jax.block_until_ready(interspg_forward(state, params))
    assert a_bf16.shape == (batch, action_dim)
    assert jnp.allclose(a_bf16, ref, atol=1e-1, rtol=1e-1)

    # Multi-step grid with a partial trailing batch tile (42 = 16 + 16 + 10 rows);
    # weights stay VMEM-resident (single-buffered) across grid steps.
    key, kx2 = jax.random.split(key)
    state_big = jax.random.normal(kx2, (42, state_dim), jnp.float32)
    a_big = jax.block_until_ready(
        interspg_forward(state_big, params, compute_dtype=jnp.float32,
                         batch_tile=16))
    assert a_big.shape == (42, action_dim)
    assert jnp.allclose(a_big, reference_forward(state_big, params),
                        atol=1e-4, rtol=1e-4)

    print("KERNEL_OK")
</pallas_src>

<mosaic_0001>
module attributes {stable_mosaic.version = 11 : i64} {
  func.func @_interspg_actor_kernel(%arg0: i32, %arg1: memref<2x16xf32, #tpu.memory_space<vmem>>, %arg2: memref<16x128xf32, #tpu.memory_space<vmem>>, %arg3: memref<1x128xf32, #tpu.memory_space<vmem>>, %arg4: memref<128x128xf32, #tpu.memory_space<vmem>>, %arg5: memref<1x128xf32, #tpu.memory_space<vmem>>, %arg6: memref<128x128xf32, #tpu.memory_space<vmem>>, %arg7: memref<1x128xf32, #tpu.memory_space<vmem>>, %arg8: memref<256x256xf32, #tpu.memory_space<vmem>>, %arg9: memref<1x256xf32, #tpu.memory_space<vmem>>, %arg10: memref<512x128xf32, #tpu.memory_space<vmem>>, %arg11: memref<1x128xf32, #tpu.memory_space<vmem>>, %arg12: memref<128x128xf32, #tpu.memory_space<vmem>>, %arg13: memref<1x128xf32, #tpu.memory_space<vmem>>, %arg14: memref<2x128xf32, #tpu.memory_space<vmem>>, %arg15: memref<2x512xf32, #tpu.memory_space<vmem>>) attributes {dimension_semantics = [#tpu.dimension_semantics<parallel>], iteration_bounds = array<i64: 1>, scalar_prefetch = 0 : i64, scratch_operands = 1 : i64, tpu.core_type = #tpu.core_type<tc>, window_params = [{transform_indices = @transform_0, window_bounds = array<i64: 2, 16>}, {pipeline_mode = #tpu.pipeline_mode<synchronous>, transform_indices = @transform_1, window_bounds = array<i64: 16, 128>}, {pipeline_mode = #tpu.pipeline_mode<synchronous>, transform_indices = @transform_2, window_bounds = array<i64: 1, 128>}, {pipeline_mode = #tpu.pipeline_mode<synchronous>, transform_indices = @transform_3, window_bounds = array<i64: 128, 128>}, {pipeline_mode = #tpu.pipeline_mode<synchronous>, transform_indices = @transform_4, window_bounds = array<i64: 1, 128>}, {pipeline_mode = #tpu.pipeline_mode<synchronous>, transform_indices = @transform_5, window_bounds = array<i64: 128, 128>}, {pipeline_mode = #tpu.pipeline_mode<synchronous>, transform_indices = @transform_6, window_bounds = array<i64: 1, 128>}, {pipeline_mode = #tpu.pipeline_mode<synchronous>, transform_indices = @transform_7, window_bounds = array<i64: 256, 256>}, {pipeline_mode = #tpu.pipeline_mode<synchronous>, transform_indices = @transform_8, window_bounds = array<i64: 1, 256>}, {pipeline_mode = #tpu.pipeline_mode<synchronous>, transform_indices = @transform_9, window_bounds = array<i64: 512, 128>}, {pipeline_mode = #tpu.pipeline_mode<synchronous>, transform_indices = @transform_10, window_bounds = array<i64: 1, 128>}, {pipeline_mode = #tpu.pipeline_mode<synchronous>, transform_indices = @transform_11, window_bounds = array<i64: 128, 128>}, {pipeline_mode = #tpu.pipeline_mode<synchronous>, transform_indices = @transform_12, window_bounds = array<i64: 1, 128>}, {transform_indices = @transform_13, window_bounds = array<i64: 2, 128>}]} {
    %c0 = arith.constant 0 : index
    %c0_0 = arith.constant 0 : index
    %0 = vector.load %arg1[%c0, %c0_0] : memref<2x16xf32, #tpu.memory_space<vmem>>, vector<2x16xf32>
    %c0_1 = arith.constant 0 : index
    %c0_2 = arith.constant 0 : index
    %1 = vector.load %arg2[%c0_1, %c0_2] : memref<16x128xf32, #tpu.memory_space<vmem>>, vector<16x128xf32>
    %cst = arith.constant dense<0.000000e+00> : vector<2x128xf32>
    %2 = tpu.matmul %0, %1, %cst {dimension_numbers = #tpu.dot_dimension_numbers<[1], [0], [0], [1], [0, 0, 1, 1], [], []>} : vector<2x16xf32>, vector<16x128xf32>, vector<2x128xf32> -> vector<2x128xf32>
    %c0_3 = arith.constant 0 : index
    %c0_4 = arith.constant 0 : index
    %3 = vector.load %arg3[%c0_3, %c0_4] : memref<1x128xf32, #tpu.memory_space<vmem>>, vector<1x128xf32>
    %4 = vector.broadcast %3 : vector<1x128xf32> to vector<2x128xf32>
    %5 = arith.addf %2, %4 : vector<2x128xf32>
    %cst_5 = arith.constant 0.000000e+00 : f32
    %6 = vector.broadcast %cst_5 : f32 to vector<2x128xf32>
    %7 = arith.maximumf %5, %6 : vector<2x128xf32>
    %c0_6 = arith.constant 0 : index
    %c0_7 = arith.constant 0 : index
    %8 = vector.load %arg4[%c0_6, %c0_7] : memref<128x128xf32, #tpu.memory_space<vmem>>, vector<128x128xf32>
    %cst_8 = arith.constant dense<0.000000e+00> : vector<2x128xf32>
    %9 = tpu.matmul %7, %8, %cst_8 {dimension_numbers = #tpu.dot_dimension_numbers<[1], [0], [0], [1], [0, 0, 1, 1], [], []>} : vector<2x128xf32>, vector<128x128xf32>, vector<2x128xf32> -> vector<2x128xf32>
    %c0_9 = arith.constant 0 : index
    %c0_10 = arith.constant 0 : index
    %10 = vector.load %arg5[%c0_9, %c0_10] : memref<1x128xf32, #tpu.memory_space<vmem>>, vector<1x128xf32>
    %11 = vector.broadcast %10 : vector<1x128xf32> to vector<2x128xf32>
    %12 = arith.addf %9, %11 : vector<2x128xf32>
    %c0_11 = arith.constant 0 : index
    %c0_12 = arith.constant 0 : index
    %13 = vector.load %arg15[%c0_11, %c0_12] : memref<2x512xf32, #tpu.memory_space<vmem>>, vector<2x128xf32>
    tpu.vector_store %arg15[%c0_11, %c0_12], %12 {strides = array<i32>} : memref<2x512xf32, #tpu.memory_space<vmem>>, vector<2x128xf32>,
    %c0_13 = arith.constant 0 : index
    %c0_14 = arith.constant 0 : index
    %14 = vector.load %arg6[%c0_13, %c0_14] : memref<128x128xf32, #tpu.memory_space<vmem>>, vector<128x128xf32>
    %cst_15 = arith.constant dense<0.000000e+00> : vector<2x128xf32>
    %15 = tpu.matmul %12, %14, %cst_15 {dimension_numbers = #tpu.dot_dimension_numbers<[1], [0], [0], [1], [0, 0, 1, 1], [], []>} : vector<2x128xf32>, vector<128x128xf32>, vector<2x128xf32> -> vector<2x128xf32>
    %c0_16 = arith.constant 0 : index
    %c0_17 = arith.constant 0 : index
    %16 = vector.load %arg7[%c0_16, %c0_17] : memref<1x128xf32, #tpu.memory_space<vmem>>, vector<1x128xf32>
    %17 = vector.broadcast %16 : vector<1x128xf32> to vector<2x128xf32>
    %18 = arith.addf %15, %17 : vector<2x128xf32>
    %cst_18 = arith.constant 3.000000e+00 : f32
    %19 = vector.broadcast %cst_18 : f32 to vector<2x128xf32>
    %20 = arith.addf %18, %19 : vector<2x128xf32>
    %cst_19 = arith.constant 0.000000e+00 : f32
    %cst_20 = arith.constant 6.000000e+00 : f32
    %21 = vector.broadcast %cst_19 : f32 to vector<2x128xf32>
    %22 = arith.maximumf %21, %20 : vector<2x128xf32>
    %23 = vector.broadcast %cst_20 : f32 to vector<2x128xf32>
    %24 = arith.minimumf %23, %22 : vector<2x128xf32>
    %25 = arith.mulf %18, %24 : vector<2x128xf32>
    %cst_21 = arith.constant 0.166666672 : f32
    %26 = vector.broadcast %cst_21 : f32 to vector<2x128xf32>
    %27 = arith.mulf %25, %26 : vector<2x128xf32>
    %c0_22 = arith.constant 0 : index
    %c128 = arith.constant 128 : index
    %28 = vector.load %arg15[%c0_22, %c128] : memref<2x512xf32, #tpu.memory_space<vmem>>, vector<2x128xf32>
    tpu.vector_store %arg15[%c0_22, %c128], %27 {strides = array<i32>} : memref<2x512xf32, #tpu.memory_space<vmem>>, vector<2x128xf32>,
    %c0_23 = arith.constant 0 : index
    %c0_24 = arith.constant 0 : index
    %29 = vector.load %arg15[%c0_23, %c0_24] : memref<2x512xf32, #tpu.memory_space<vmem>>, vector<2x256xf32>
    %c0_25 = arith.constant 0 : index
    %c0_26 = arith.constant 0 : index
    %30 = vector.load %arg8[%c0_25, %c0_26] : memref<256x256xf32, #tpu.memory_space<vmem>>, vector<256x256xf32>
    %cst_27 = arith.constant dense<0.000000e+00> : vector<2x256xf32>
    %31 = tpu.matmul %29, %30, %cst_27 {dimension_numbers = #tpu.dot_dimension_numbers<[1], [0], [0], [1], [0, 0, 1, 1], [], []>} : vector<2x256xf32>, vector<256x256xf32>, vector<2x256xf32> -> vector<2x256xf32>
    %c0_28 = arith.constant 0 : index
    %c0_29 = arith.constant 0 : index
    %32 = vector.load %arg9[%c0_28, %c0_29] : memref<1x256xf32, #tpu.memory_space<vmem>>, vector<1x256xf32>
    %33 = vector.broadcast %32 : vector<1x256xf32> to vector<2x256xf32>
    %34 = arith.addf %31, %33 : vector<2x256xf32>
    %cst_30 = arith.constant 3.000000e+00 : f32
    %35 = vector.broadcast %cst_30 : f32 to vector<2x256xf32>
    %36 = arith.addf %34, %35 : vector<2x256xf32>
    %cst_31 = arith.constant 0.000000e+00 : f32
    %cst_32 = arith.constant 6.000000e+00 : f32
    %37 = vector.broadcast %cst_31 : f32 to vector<2x256xf32>
    %38 = arith.maximumf %37, %36 : vector<2x256xf32>
    %39 = vector.broadcast %cst_32 : f32 to vector<2x256xf32>
    %40 = arith.minimumf %39, %38 : vector<2x256xf32>
    %41 = arith.mulf %34, %40 : vector<2x256xf32>
    %cst_33 = arith.constant 0.166666672 : f32
    %42 = vector.broadcast %cst_33 : f32 to vector<2x256xf32>
    %43 = arith.mulf %41, %42 : vector<2x256xf32>
    %c0_34 = arith.constant 0 : index
    %c256 = arith.constant 256 : index
    %44 = vector.load %arg15[%c0_34, %c256] : memref<2x512xf32, #tpu.memory_space<vmem>>, vector<2x256xf32>
    tpu.vector_store %arg15[%c0_34, %c256], %43 {strides = array<i32>} : memref<2x512xf32, #tpu.memory_space<vmem>>, vector<2x256xf32>,
    %c0_35 = arith.constant 0 : index
    %c0_36 = arith.constant 0 : index
    %45 = vector.load %arg15[%c0_35, %c0_36] : memref<2x512xf32, #tpu.memory_space<vmem>>, vector<2x512xf32>
    %c0_37 = arith.constant 0 : index
    %c0_38 = arith.constant 0 : index
    %46 = vector.load %arg10[%c0_37, %c0_38] : memref<512x128xf32, #tpu.memory_space<vmem>>, vector<512x128xf32>
    %cst_39 = arith.constant dense<0.000000e+00> : vector<2x128xf32>
    %47 = tpu.matmul %45, %46, %cst_39 {dimension_numbers = #tpu.dot_dimension_numbers<[1], [0], [0], [1], [0, 0, 1, 1], [], []>} : vector<2x512xf32>, vector<512x128xf32>, vector<2x128xf32> -> vector<2x128xf32>
    %c0_40 = arith.constant 0 : index
    %c0_41 = arith.constant 0 : index
    %48 = vector.load %arg11[%c0_40, %c0_41] : memref<1x128xf32, #tpu.memory_space<vmem>>, vector<1x128xf32>
    %49 = vector.broadcast %48 : vector<1x128xf32> to vector<2x128xf32>
    %50 = arith.addf %47, %49 : vector<2x128xf32>
    %cst_42 = arith.constant 0.000000e+00 : f32
    %51 = vector.broadcast %cst_42 : f32 to vector<2x128xf32>
    %52 = arith.maximumf %50, %51 : vector<2x128xf32>
    %c0_43 = arith.constant 0 : index
    %c0_44 = arith.constant 0 : index
    %53 = vector.load %arg12[%c0_43, %c0_44] : memref<128x128xf32, #tpu.memory_space<vmem>>, vector<128x128xf32>
    %cst_45 = arith.constant dense<0.000000e+00> : vector<2x128xf32>
    %54 = tpu.matmul %52, %53, %cst_45 {dimension_numbers = #tpu.dot_dimension_numbers<[1], [0], [0], [1], [0, 0, 1, 1], [], []>} : vector<2x128xf32>, vector<128x128xf32>, vector<2x128xf32> -> vector<2x128xf32>
    %c0_46 = arith.constant 0 : index
    %c0_47 = arith.constant 0 : index
    %55 = vector.load %arg13[%c0_46, %c0_47] : memref<1x128xf32, #tpu.memory_space<vmem>>, vector<1x128xf32>
    %56 = vector.broadcast %55 : vector<1x128xf32> to vector<2x128xf32>
    %57 = arith.addf %54, %56 : vector<2x128xf32>
    %58 = math.tanh %57 : vector<2x128xf32>
    %c0_48 = arith.constant 0 : index
    %c0_49 = arith.constant 0 : index
    %59 = vector.load %arg14[%c0_48, %c0_49] : memref<2x128xf32, #tpu.memory_space<vmem>>, vector<2x128xf32>
    tpu.vector_store %arg14[%c0_48, %c0_49], %58 {strides = array<i32>} : memref<2x128xf32, #tpu.memory_space<vmem>>, vector<2x128xf32>,
    return
  }
  func.func @transform_0(%arg0: i32) -> (i32, i32) {
    %c0_i32 = arith.constant 0 : i32
    %c0_i32_0 = arith.constant 0 : i32
    return %arg0, %c0_i32 : i32, i32
  }
  func.func @transform_1(%arg0: i32) -> (i32, i32) {
    %c0_i32 = arith.constant 0 : i32
    %c0_i32_0 = arith.constant 0 : i32
    %c0_i32_1 = arith.constant 0 : i32
    return %c0_i32, %c0_i32_0 : i32, i32
  }
  func.func @transform_2(%arg0: i32) -> (i32, i32) {
    %c0_i32 = arith.constant 0 : i32
    %c0_i32_0 = arith.constant 0 : i32
    %c0_i32_1 = arith.constant 0 : i32
    return %c0_i32, %c0_i32_0 : i32, i32
  }
  func.func @transform_3(%arg0: i32) -> (i32, i32) {
    %c0_i32 = arith.constant 0 : i32
    %c0_i32_0 = arith.constant 0 : i32
    %c0_i32_1 = arith.constant 0 : i32
    return %c0_i32, %c0_i32_0 : i32, i32
  }
  func.func @transform_4(%arg0: i32) -> (i32, i32) {
    %c0_i32 = arith.constant 0 : i32
    %c0_i32_0 = arith.constant 0 : i32
    %c0_i32_1 = arith.constant 0 : i32
    return %c0_i32, %c0_i32_0 : i32, i32
  }
  func.func @transform_5(%arg0: i32) -> (i32, i32) {
    %c0_i32 = arith.constant 0 : i32
    %c0_i32_0 = arith.constant 0 : i32
    %c0_i32_1 = arith.constant 0 : i32
    return %c0_i32, %c0_i32_0 : i32, i32
  }
  func.func @transform_6(%arg0: i32) -> (i32, i32) {
    %c0_i32 = arith.constant 0 : i32
    %c0_i32_0 = arith.constant 0 : i32
    %c0_i32_1 = arith.constant 0 : i32
    return %c0_i32, %c0_i32_0 : i32, i32
  }
  func.func @transform_7(%arg0: i32) -> (i32, i32) {
    %c0_i32 = arith.constant 0 : i32
    %c0_i32_0 = arith.constant 0 : i32
    %c0_i32_1 = arith.constant 0 : i32
    return %c0_i32, %c0_i32_0 : i32, i32
  }
  func.func @transform_8(%arg0: i32) -> (i32, i32) {
    %c0_i32 = arith.constant 0 : i32
    %c0_i32_0 = arith.constant 0 : i32
    %c0_i32_1 = arith.constant 0 : i32
    return %c0_i32, %c0_i32_0 : i32, i32
  }
  func.func @transform_9(%arg0: i32) -> (i32, i32) {
    %c0_i32 = arith.constant 0 : i32
    %c0_i32_0 = arith.constant 0 : i32
    %c0_i32_1 = arith.constant 0 : i32
    return %c0_i32, %c0_i32_0 : i32, i32
  }
  func.func @transform_10(%arg0: i32) -> (i32, i32) {
    %c0_i32 = arith.constant 0 : i32
    %c0_i32_0 = arith.constant 0 : i32
    %c0_i32_1 = arith.constant 0 : i32
    return %c0_i32, %c0_i32_0 : i32, i32
  }
  func.func @transform_11(%arg0: i32) -> (i32, i32) {
    %c0_i32 = arith.constant 0 : i32
    %c0_i32_0 = arith.constant 0 : i32
    %c0_i32_1 = arith.constant 0 : i32
    return %c0_i32, %c0_i32_0 : i32, i32
  }
  func.func @transform_12(%arg0: i32) -> (i32, i32) {
    %c0_i32 = arith.constant 0 : i32
    %c0_i32_0 = arith.constant 0 : i32
    %c0_i32_1 = arith.constant 0 : i32
    return %c0_i32, %c0_i32_0 : i32, i32
  }
  func.func @transform_13(%arg0: i32) -> (i32, i32) {
    %c0_i32 = arith.constant 0 : i32
    %c0_i32_0 = arith.constant 0 : i32
    return %arg0, %c0_i32 : i32, i32
  }
}

module attributes {stable_mosaic.version = 11 : i64} {
  func.func @_interspg_actor_kernel(%arg0: i32, %arg1: memref<2x16xf32, #tpu.memory_space<vmem>>, %arg2: memref<16x128xf32, #tpu.memory_space<vmem>>, %arg3: memref<1x128xf32, #tpu.memory_space<vmem>>, %arg4: memref<128x128xf32, #tpu.memory_space<vmem>>, %arg5: memref<1x128xf32, #tpu.memory_space<vmem>>, %arg6: memref<128x128xf32, #tpu.memory_space<vmem>>, %arg7: memref<1x128xf32, #tpu.memory_space<vmem>>, %arg8: memref<256x256xf32, #tpu.memory_space<vmem>>, %arg9: memref<1x256xf32, #tpu.memory_space<vmem>>, %arg10: memref<512x128xf32, #tpu.memory_space<vmem>>, %arg11: memref<1x128xf32, #tpu.memory_space<vmem>>, %arg12: memref<128x128xf32, #tpu.memory_space<vmem>>, %arg13: memref<1x128xf32, #tpu.memory_space<vmem>>, %arg14: memref<2x128xf32, #tpu.memory_space<vmem>>, %arg15: memref<2x512xf32, #tpu.memory_space<vmem>>) attributes {dimension_semantics = [#tpu.dimension_semantics<parallel>], iteration_bounds = array<i64: 1>, scalar_prefetch = 0 : i64, scratch_operands = 1 : i64, tpu.core_type = #tpu.core_type<tc>, window_params = [{transform_indices = @transform_0, window_bounds = array<i64: 2, 16>}, {pipeline_mode = #tpu.pipeline_mode<synchronous>, transform_indices = @transform_1, window_bounds = array<i64: 16, 128>}, {pipeline_mode = #tpu.pipeline_mode<synchronous>, transform_indices = @transform_2, window_bounds = array<i64: 1, 128>}, {pipeline_mode = #tpu.pipeline_mode<synchronous>, transform_indices = @transform_3, window_bounds = array<i64: 128, 128>}, {pipeline_mode = #tpu.pipeline_mode<synchronous>, transform_indices = @transform_4, window_bounds = array<i64: 1, 128>}, {pipeline_mode = #tpu.pipeline_mode<synchronous>, transform_indices = @transform_5, window_bounds = array<i64: 128, 128>}, {pipeline_mode = #tpu.pipeline_mode<synchronous>, transform_indices = @transform_6, window_bounds = array<i64: 1, 128>}, {pipeline_mode = #tpu.pipeline_mode<synchronous>, transform_indices = @transform_7, window_bounds = array<i64: 256, 256>}, {pipeline_mode = #tpu.pipeline_mode<synchronous>, transform_indices = @transform_8, window_bounds = array<i64: 1, 256>}, {pipeline_mode = #tpu.pipeline_mode<synchronous>, transform_indices = @transform_9, window_bounds = array<i64: 512, 128>}, {pipeline_mode = #tpu.pipeline_mode<synchronous>, transform_indices = @transform_10, window_bounds = array<i64: 1, 128>}, {pipeline_mode = #tpu.pipeline_mode<synchronous>, transform_indices = @transform_11, window_bounds = array<i64: 128, 128>}, {pipeline_mode = #tpu.pipeline_mode<synchronous>, transform_indices = @transform_12, window_bounds = array<i64: 1, 128>}, {transform_indices = @transform_13, window_bounds = array<i64: 2, 128>}]} {
    %c0 = arith.constant 0 : index
    %c0_0 = arith.constant 0 : index
    %0 = vector.load %arg1[%c0, %c0_0] : memref<2x16xf32, #tpu.memory_space<vmem>>, vector<2x16xf32>
    %c0_1 = arith.constant 0 : index
    %c0_2 = arith.constant 0 : index
    %1 = vector.load %arg2[%c0_1, %c0_2] : memref<16x128xf32, #tpu.memory_space<vmem>>, vector<16x128xf32>
    %cst = arith.constant dense<0.000000e+00> : vector<2x128xf32>
    %2 = tpu.matmul %0, %1, %cst {dimension_numbers = #tpu.dot_dimension_numbers<[1], [0], [0], [1], [0, 0, 1, 1], [], []>} : vector<2x16xf32>, vector<16x128xf32>, vector<2x128xf32> -> vector<2x128xf32>
    %c0_3 = arith.constant 0 : index
    %c0_4 = arith.constant 0 : index
    %3 = vector.load %arg3[%c0_3, %c0_4] : memref<1x128xf32, #tpu.memory_space<vmem>>, vector<1x128xf32>
    %4 = vector.broadcast %3 : vector<1x128xf32> to vector<2x128xf32>
    %5 = arith.addf %2, %4 : vector<2x128xf32>
    %cst_5 = arith.constant 0.000000e+00 : f32
    %6 = vector.broadcast %cst_5 : f32 to vector<2x128xf32>
    %7 = arith.maximumf %5, %6 : vector<2x128xf32>
    %c0_6 = arith.constant 0 : index
    %c0_7 = arith.constant 0 : index
    %8 = vector.load %arg4[%c0_6, %c0_7] : memref<128x128xf32, #tpu.memory_space<vmem>>, vector<128x128xf32>
    %cst_8 = arith.constant dense<0.000000e+00> : vector<2x128xf32>
    %9 = tpu.matmul %7, %8, %cst_8 {dimension_numbers = #tpu.dot_dimension_numbers<[1], [0], [0], [1], [0, 0, 1, 1], [], []>} : vector<2x128xf32>, vector<128x128xf32>, vector<2x128xf32> -> vector<2x128xf32>
    %c0_9 = arith.constant 0 : index
    %c0_10 = arith.constant 0 : index
    %10 = vector.load %arg5[%c0_9, %c0_10] : memref<1x128xf32, #tpu.memory_space<vmem>>, vector<1x128xf32>
    %11 = vector.broadcast %10 : vector<1x128xf32> to vector<2x128xf32>
    %12 = arith.addf %9, %11 : vector<2x128xf32>
    %c0_11 = arith.constant 0 : index
    %c0_12 = arith.constant 0 : index
    %13 = vector.load %arg15[%c0_11, %c0_12] : memref<2x512xf32, #tpu.memory_space<vmem>>, vector<2x128xf32>
    tpu.vector_store %arg15[%c0_11, %c0_12], %12 {strides = array<i32>} : memref<2x512xf32, #tpu.memory_space<vmem>>, vector<2x128xf32>,
    %c0_13 = arith.constant 0 : index
    %c0_14 = arith.constant 0 : index
    %14 = vector.load %arg6[%c0_13, %c0_14] : memref<128x128xf32, #tpu.memory_space<vmem>>, vector<128x128xf32>
    %cst_15 = arith.constant dense<0.000000e+00> : vector<2x128xf32>
    %15 = tpu.matmul %12, %14, %cst_15 {dimension_numbers = #tpu.dot_dimension_numbers<[1], [0], [0], [1], [0, 0, 1, 1], [], []>} : vector<2x128xf32>, vector<128x128xf32>, vector<2x128xf32> -> vector<2x128xf32>
    %c0_16 = arith.constant 0 : index
    %c0_17 = arith.constant 0 : index
    %16 = vector.load %arg7[%c0_16, %c0_17] : memref<1x128xf32, #tpu.memory_space<vmem>>, vector<1x128xf32>
    %17 = vector.broadcast %16 : vector<1x128xf32> to vector<2x128xf32>
    %18 = arith.addf %15, %17 : vector<2x128xf32>
    %cst_18 = arith.constant 3.000000e+00 : f32
    %19 = vector.broadcast %cst_18 : f32 to vector<2x128xf32>
    %20 = arith.addf %18, %19 : vector<2x128xf32>
    %cst_19 = arith.constant 0.000000e+00 : f32
    %cst_20 = arith.constant 6.000000e+00 : f32
    %21 = vector.broadcast %cst_19 : f32 to vector<2x128xf32>
    %22 = arith.maximumf %21, %20 : vector<2x128xf32>
    %23 = vector.broadcast %cst_20 : f32 to vector<2x128xf32>
    %24 = arith.minimumf %23, %22 : vector<2x128xf32>
    %25 = arith.mulf %18, %24 : vector<2x128xf32>
    %cst_21 = arith.constant 0.166666672 : f32
    %26 = vector.broadcast %cst_21 : f32 to vector<2x128xf32>
    %27 = arith.mulf %25, %26 : vector<2x128xf32>
    %c0_22 = arith.constant 0 : index
    %c128 = arith.constant 128 : index
    %28 = vector.load %arg15[%c0_22, %c128] : memref<2x512xf32, #tpu.memory_space<vmem>>, vector<2x128xf32>
    tpu.vector_store %arg15[%c0_22, %c128], %27 {strides = array<i32>} : memref<2x512xf32, #tpu.memory_space<vmem>>, vector<2x128xf32>,
    %c0_23 = arith.constant 0 : index
    %c0_24 = arith.constant 0 : index
    %29 = vector.load %arg15[%c0_23, %c0_24] : memref<2x512xf32, #tpu.memory_space<vmem>>, vector<2x256xf32>
    %c0_25 = arith.constant 0 : index
    %c0_26 = arith.constant 0 : index
    %30 = vector.load %arg8[%c0_25, %c0_26] : memref<256x256xf32, #tpu.memory_space<vmem>>, vector<256x256xf32>
    %cst_27 = arith.constant dense<0.000000e+00> : vector<2x256xf32>
    %31 = tpu.matmul %29, %30, %cst_27 {dimension_numbers = #tpu.dot_dimension_numbers<[1], [0], [0], [1], [0, 0, 1, 1], [], []>} : vector<2x256xf32>, vector<256x256xf32>, vector<2x256xf32> -> vector<2x256xf32>
    %c0_28 = arith.constant 0 : index
    %c0_29 = arith.constant 0 : index
    %32 = vector.load %arg9[%c0_28, %c0_29] : memref<1x256xf32, #tpu.memory_space<vmem>>, vector<1x256xf32>
    %33 = vector.broadcast %32 : vector<1x256xf32> to vector<2x256xf32>
    %34 = arith.addf %31, %33 : vector<2x256xf32>
    %cst_30 = arith.constant 3.000000e+00 : f32
    %35 = vector.broadcast %cst_30 : f32 to vector<2x256xf32>
    %36 = arith.addf %34, %35 : vector<2x256xf32>
    %cst_31 = arith.constant 0.000000e+00 : f32
    %cst_32 = arith.constant 6.000000e+00 : f32
    %37 = vector.broadcast %cst_31 : f32 to vector<2x256xf32>
    %38 = arith.maximumf %37, %36 : vector<2x256xf32>
    %39 = vector.broadcast %cst_32 : f32 to vector<2x256xf32>
    %40 = arith.minimumf %39, %38 : vector<2x256xf32>
    %41 = arith.mulf %34, %40 : vector<2x256xf32>
    %cst_33 = arith.constant 0.166666672 : f32
    %42 = vector.broadcast %cst_33 : f32 to vector<2x256xf32>
    %43 = arith.mulf %41, %42 : vector<2x256xf32>
    %c0_34 = arith.constant 0 : index
    %c256 = arith.constant 256 : index
    %44 = vector.load %arg15[%c0_34, %c256] : memref<2x512xf32, #tpu.memory_space<vmem>>, vector<2x256xf32>
    tpu.vector_store %arg15[%c0_34, %c256], %43 {strides = array<i32>} : memref<2x512xf32, #tpu.memory_space<vmem>>, vector<2x256xf32>,
    %c0_35 = arith.constant 0 : index
    %c0_36 = arith.constant 0 : index
    %45 = vector.load %arg15[%c0_35, %c0_36] : memref<2x512xf32, #tpu.memory_space<vmem>>, vector<2x512xf32>
    %c0_37 = arith.constant 0 : index
    %c0_38 = arith.constant 0 : index
    %46 = vector.load %arg10[%c0_37, %c0_38] : memref<512x128xf32, #tpu.memory_space<vmem>>, vector<512x128xf32>
    %cst_39 = arith.constant dense<0.000000e+00> : vector<2x128xf32>
    %47 = tpu.matmul %45, %46, %cst_39 {dimension_numbers = #tpu.dot_dimension_numbers<[1], [0], [0], [1], [0, 0, 1, 1], [], []>} : vector<2x512xf32>, vector<512x128xf32>, vector<2x128xf32> -> vector<2x128xf32>
    %c0_40 = arith.constant 0 : index
    %c0_41 = arith.constant 0 : index
    %48 = vector.load %arg11[%c0_40, %c0_41] : memref<1x128xf32, #tpu.memory_space<vmem>>, vector<1x128xf32>
    %49 = vector.broadcast %48 : vector<1x128xf32> to vector<2x128xf32>
    %50 = arith.addf %47, %49 : vector<2x128xf32>
    %cst_42 = arith.constant 0.000000e+00 : f32
    %51 = vector.broadcast %cst_42 : f32 to vector<2x128xf32>
    %52 = arith.maximumf %50, %51 : vector<2x128xf32>
    %c0_43 = arith.constant 0 : index
    %c0_44 = arith.constant 0 : index
    %53 = vector.load %arg12[%c0_43, %c0_44] : memref<128x128xf32, #tpu.memory_space<vmem>>, vector<128x128xf32>
    %cst_45 = arith.constant dense<0.000000e+00> : vector<2x128xf32>
    %54 = tpu.matmul %52, %53, %cst_45 {dimension_numbers = #tpu.dot_dimension_numbers<[1], [0], [0], [1], [0, 0, 1, 1], [], []>} : vector<2x128xf32>, vector<128x128xf32>, vector<2x128xf32> -> vector<2x128xf32>
    %c0_46 = arith.constant 0 : index
    %c0_47 = arith.constant 0 : index
    %55 = vector.load %arg13[%c0_46, %c0_47] : memref<1x128xf32, #tpu.memory_space<vmem>>, vector<1x128xf32>
    %56 = vector.broadcast %55 : vector<1x128xf32> to vector<2x128xf32>
    %57 = arith.addf %54, %56 : vector<2x128xf32>
    %58 = math.tanh %57 : vector<2x128xf32>
    %c0_48 = arith.constant 0 : index
    %c0_49 = arith.constant 0 : index
    %59 = vector.load %arg14[%c0_48, %c0_49] : memref<2x128xf32, #tpu.memory_space<vmem>>, vector<2x128xf32>
    tpu.vector_store %arg14[%c0_48, %c0_49], %58 {strides = array<i32>} : memref<2x128xf32, #tpu.memory_space<vmem>>, vector<2x128xf32>,
    return
  }
  func.func @transform_0(%arg0: i32) -> (i32, i32) {
    %c0_i32 = arith.constant 0 : i32
    %c0_i32_0 = arith.constant 0 : i32
    return %arg0, %c0_i32 : i32, i32
  }
  func.func @transform_1(%arg0: i32) -> (i32, i32) {
    %c0_i32 = arith.constant 0 : i32
    %c0_i32_0 = arith.constant 0 : i32
    %c0_i32_1 = arith.constant 0 : i32
    return %c0_i32, %c0_i32_0 : i32, i32
  }
  func.func @transform_2(%arg0: i32) -> (i32, i32) {
    %c0_i32 = arith.constant 0 : i32
    %c0_i32_0 = arith.constant 0 : i32
    %c0_i32_1 = arith.constant 0 : i32
    return %c0_i32, %c0_i32_0 : i32, i32
  }
  func.func @transform_3(%arg0: i32) -> (i32, i32) {
    %c0_i32 = arith.constant 0 : i32
    %c0_i32_0 = arith.constant 0 : i32
    %c0_i32_1 = arith.constant 0 : i32
    return %c0_i32, %c0_i32_0 : i32, i32
  }
  func.func @transform_4(%arg0: i32) -> (i32, i32) {
    %c0_i32 = arith.constant 0 : i32
    %c0_i32_0 = arith.constant 0 : i32
    %c0_i32_1 = arith.constant 0 : i32
    return %c0_i32, %c0_i32_0 : i32, i32
  }
  func.func @transform_5(%arg0: i32) -> (i32, i32) {
    %c0_i32 = arith.constant 0 : i32
    %c0_i32_0 = arith.constant 0 : i32
    %c0_i32_1 = arith.constant 0 : i32
    return %c0_i32, %c0_i32_0 : i32, i32
  }
  func.func @transform_6(%arg0: i32) -> (i32, i32) {
    %c0_i32 = arith.constant 0 : i32
    %c0_i32_0 = arith.constant 0 : i32
    %c0_i32_1 = arith.constant 0 : i32
    return %c0_i32, %c0_i32_0 : i32, i32
  }
  func.func @transform_7(%arg0: i32) -> (i32, i32) {
    %c0_i32 = arith.constant 0 : i32
    %c0_i32_0 = arith.constant 0 : i32
    %c0_i32_1 = arith.constant 0 : i32
    return %c0_i32, %c0_i32_0 : i32, i32
  }
  func.func @transform_8(%arg0: i32) -> (i32, i32) {
    %c0_i32 = arith.constant 0 : i32
    %c0_i32_0 = arith.constant 0 : i32
    %c0_i32_1 = arith.constant 0 : i32
    return %c0_i32, %c0_i32_0 : i32, i32
  }
  func.func @transform_9(%arg0: i32) -> (i32, i32) {
    %c0_i32 = arith.constant 0 : i32
    %c0_i32_0 = arith.constant 0 : i32
    %c0_i32_1 = arith.constant 0 : i32
    return %c0_i32, %c0_i32_0 : i32, i32
  }
  func.func @transform_10(%arg0: i32) -> (i32, i32) {
    %c0_i32 = arith.constant 0 : i32
    %c0_i32_0 = arith.constant 0 : i32
    %c0_i32_1 = arith.constant 0 : i32
    return %c0_i32, %c0_i32_0 : i32, i32
  }
  func.func @transform_11(%arg0: i32) -> (i32, i32) {
    %c0_i32 = arith.constant 0 : i32
    %c0_i32_0 = arith.constant 0 : i32
    %c0_i32_1 = arith.constant 0 : i32
    return %c0_i32, %c0_i32_0 : i32, i32
  }
  func.func @transform_12(%arg0: i32) -> (i32, i32) {
    %c0_i32 = arith.constant 0 : i32
    %c0_i32_0 = arith.constant 0 : i32
    %c0_i32_1 = arith.constant 0 : i32
    return %c0_i32, %c0_i32_0 : i32, i32
  }
  func.func @transform_13(%arg0: i32) -> (i32, i32) {
    %c0_i32 = arith.constant 0 : i32
    %c0_i32_0 = arith.constant 0 : i32
    return %arg0, %c0_i32 : i32, i32
  }
}

</mosaic_0001>

<bundles_post_ra>
// kernel: tpu_custom_call.1
= control target key start
LH: loop header
LB: loop body
LE: loop exit
PB: predicated region body
PF: predicated region fallthrough
CT: control target
= control target key end

     0   :  { %18 = vsyncpa [#allocation4], 0  ;;  %s1845_s0 = inlined_call_operand.hbm [shape: f32[2,16], index: 0, kind: input, shape index: {}]   ;;  %s1846_s1 = inlined_call_operand.hbm [shape: f32[16,128], index: 1, kind: input, shape index: {}]   ;;  %s1847_s2 = inlined_call_operand.vmem [shape: f32[1,128], index: 2, kind: input, shape index: {}]   ;;  %s1848_s3 = inlined_call_operand.hbm [shape: f32[128,128], index: 3, kind: input, shape index: {}]   ;;  %s1849_s4 = inlined_call_operand.vmem [shape: f32[1,128], index: 4, kind: input, shape index: {}]   ;;  %s1850_s5 = inlined_call_operand.hbm [shape: f32[128,128], index: 5, kind: input, shape index: {}]   ;;  %s1851_s6 = inlined_call_operand.vmem [shape: f32[1,128], index: 6, kind: input, shape index: {}]   ;;  %s1852_s7 = inlined_call_operand.hbm [shape: f32[256,256], index: 7, kind: input, shape index: {}]   ;;  %s1853_s8 = inlined_call_operand.vmem [shape: f32[1,256], index: 8, kind: input, shape index: {}]   ;;  %s1854_s9 = inlined_call_operand.hbm [shape: f32[512,128], index: 9, kind: input, shape index: {}]   ;;  %s1855_s10 = inlined_call_operand.vmem [shape: f32[1,128], index: 10, kind: input, shape index: {}]   ;;  %s1856_s11 = inlined_call_operand.hbm [shape: f32[128,128], index: 11, kind: input, shape index: {}]   ;;  %s1857_s12 = inlined_call_operand.vmem [shape: f32[1,128], index: 12, kind: input, shape index: {}]   ;;  %s1858_s13 = inlined_call_operand.hbm [shape: f32[2,128], index: 13, kind: output, shape index: {}]  }
   0x1   :  { %19 = vsyncpa [#allocation7], 0 }
   0x2   :  { %20 = vsyncpa [#allocation10], 0 }
   0x3   :  { %21 = vsyncpa [#allocation13], 0 }
   0x4   :  { %22 = vsyncpa [#allocation5], 0  ;;  %s1597_s25 = smov [#allocation6]   ;;  %s1411_s29 = scalar_lea.hbm %s1846_s1, 256 }
   0x5   :  { %s38_s26 = sshll.u32 %s1597_s25, 4  ;;  %p1412_p0 = scmp.ne.s32.totalorder %s1846_s1, %s1411_s29  ;;  %s39_s26 = int_to_ptr.vmem [resolvable:$true] %s38_s26 }
   0x6   :  { %p1415_p1 = scmp.lt.u32.totalorder %s1411_s29, %s1846_s1 }
   0x8   :  { %p1417_p2 = pnand %p1415_p1, %p1412_p0 }
   0xa   :  { %1420 = shalt.err (!%p1417_p2)
}
   0xb   :  { %s1421_s17 = scalar_lea.vmem %s39_s26, 256  ;;  %p1426_p4 = scmp.lt.s32.totalorder %s39_s26, %s39_s26 }
   0xc   :  { %p1422_p3 = scmp.ne.s32.totalorder %s39_s26, %s1421_s17  ;;  %p1427_p5 = scmp.lt.s32.totalorder %s1421_s17, %s1421_s17 }
   0xe   :  { %p1428_p6 = por %p1427_p5, %p1426_p4 }
  0x10   :  { %p1429_p7 = pnand %p1428_p6, %p1422_p3 }
  0x12   :  { %1432 = shalt.err (!%p1429_p7)
}
  0x13   :  { %s1598_s18 = smov 128   ;;  %s1599_s19 = smov 8  }
  0x14   :  { %44 = dma.hbm_to_vmem [thread:$0]  %s1846_s1, 256, %s39_s26, [#allocation7], %s1598_s18, %s1598_s18, %s1599_s19  }
  0x15   :  { %s1600_s22 = smov [#allocation9]   ;;  %s1601_s24 = smov [#allocation12]  }
  0x16   :  { %s66_s23 = sshll.u32 %s1600_s22, 4  ;;  %s94_s25 = sshll.u32 %s1601_s24, 4  ;;  %s67_s23 = int_to_ptr.vmem [resolvable:$true] %s66_s23  ;;  %s95_s25 = int_to_ptr.vmem [resolvable:$true] %s94_s25 }
  0x17   :  { %s1433_s29 = scalar_lea.hbm %s1850_s5, 2048 }
  0x18   :  { %p1434_p8 = scmp.ne.s32.totalorder %s1850_s5, %s1433_s29  ;;  %p1437_p9 = scmp.lt.u32.totalorder %s1433_s29, %s1850_s5 }
  0x1a   :  { %p1439_p10 = pnand %p1437_p9, %p1434_p8 }
  0x1c   :  { %1442 = shalt.err (!%p1439_p10)
}
  0x1d   :  { %s1443_s1 = scalar_lea.vmem %s67_s23, 2048  ;;  %p1448_p12 = scmp.lt.s32.totalorder %s67_s23, %s67_s23 }
  0x1e   :  { %p1444_p11 = scmp.ne.s32.totalorder %s67_s23, %s1443_s1  ;;  %p1449_p13 = scmp.lt.s32.totalorder %s1443_s1, %s1443_s1 }
  0x20   :  { %p1450_p0 = por %p1449_p13, %p1448_p12 }
  0x22   :  { %p1451_p1 = pnand %p1450_p0, %p1444_p11 }
  0x24   :  { %1454 = shalt.err (!%p1451_p1)
}
  0x25   :  { %72 = dma.hbm_to_vmem [thread:$0]  %s1850_s5, 2048, %s67_s23, [#allocation10], %s1598_s18, %s1598_s18, %s1599_s19  }
  0x26   :  { %s1455_s22 = scalar_lea.hbm %s1854_s9, 8192 }
  0x27   :  { %p1456_p2 = scmp.ne.s32.totalorder %s1854_s9, %s1455_s22  ;;  %p1459_p3 = scmp.lt.u32.totalorder %s1455_s22, %s1854_s9 }
  0x29   :  { %p1461_p4 = pnand %p1459_p3, %p1456_p2 }
  0x2b   :  { %1464 = shalt.err (!%p1461_p4)
}
  0x2c   :  { %s1465_s30 = scalar_lea.vmem %s95_s25, 8192  ;;  %p1470_p6 = scmp.lt.s32.totalorder %s95_s25, %s95_s25 }
  0x2d   :  { %p1466_p5 = scmp.ne.s32.totalorder %s95_s25, %s1465_s30  ;;  %p1471_p7 = scmp.lt.s32.totalorder %s1465_s30, %s1465_s30 }
  0x2f   :  { %p1472_p8 = por %p1471_p7, %p1470_p6 }
  0x31   :  { %p1473_p9 = pnand %p1472_p8, %p1466_p5 }
  0x33   :  { %1476 = shalt.err (!%p1473_p9)
}
  0x34   :  { %100 = dma.hbm_to_vmem [thread:$0]  %s1854_s9, 8192, %s95_s25, [#allocation13], %s1598_s18, %s1598_s18, %s1599_s19  }
  0x35   :  { %s1602_s14 = smov [#allocation3]   ;;  %s1603_s16 = smov [#allocation8]  }
  0x36   :  { %s29_s15 = sshll.u32 %s1602_s14, 4  ;;  %s52_s1 = sshll.u32 %s1603_s16, 4  ;;  %s30_s15 = int_to_ptr.vmem [resolvable:$true] %s29_s15  ;;  %s53_s1 = int_to_ptr.vmem [resolvable:$true] %s52_s1 }
  0x37   :  { %s1477_s20 = scalar_lea.hbm %s1845_s0, 32 }
  0x38   :  { %p1478_p10 = scmp.ne.s32.totalorder %s1845_s0, %s1477_s20  ;;  %p1481_p11 = scmp.lt.u32.totalorder %s1477_s20, %s1845_s0 }
  0x3a   :  { %p1483_p12 = pnand %p1481_p11, %p1478_p10 }
  0x3c   :  { %1486 = shalt.err (!%p1483_p12)
}
  0x3d   :  { %s1487_s9 = scalar_lea.vmem %s30_s15, 32  ;;  %p1492_p0 = scmp.lt.s32.totalorder %s30_s15, %s30_s15 }
  0x3e   :  { %p1488_p13 = scmp.ne.s32.totalorder %s30_s15, %s1487_s9  ;;  %p1493_p1 = scmp.lt.s32.totalorder %s1487_s9, %s1487_s9 }
  0x40   :  { %p1494_p2 = por %p1493_p1, %p1492_p0 }
  0x42   :  { %p1495_p3 = pnand %p1494_p2, %p1488_p13 }
  0x44   :  { %1498 = shalt.err (!%p1495_p3)
}
  0x45   :  { %32 = dma.hbm_to_vmem [thread:$0]  %s1845_s0, 32, %s30_s15, [#allocation4]  }
  0x46   :  { %s1499_s5 = scalar_lea.hbm %s1848_s3, 2048 }
  0x47   :  { %p1500_p4 = scmp.ne.s32.totalorder %s1848_s3, %s1499_s5  ;;  %p1503_p5 = scmp.lt.u32.totalorder %s1499_s5, %s1848_s3 }
  0x49   :  { %p1505_p6 = pnand %p1503_p5, %p1500_p4 }
  0x4b   :  { %1508 = shalt.err (!%p1505_p6)
}
  0x4c   :  { %s1509_s17 = scalar_lea.vmem %s53_s1, 2048  ;;  %p1514_p8 = scmp.lt.s32.totalorder %s53_s1, %s53_s1 }
  0x4d   :  { %p1510_p7 = scmp.ne.s32.totalorder %s53_s1, %s1509_s17  ;;  %p1515_p9 = scmp.lt.s32.totalorder %s1509_s17, %s1509_s17 }
  0x4f   :  { %p1516_p10 = por %p1515_p9, %p1514_p8 }
  0x51   :  { %p1517_p11 = pnand %p1516_p10, %p1510_p7 }
  0x53   :  { %1520 = shalt.err (!%p1517_p11)
}
  0x54   :  { %58 = dma.hbm_to_vmem [thread:$0]  %s1848_s3, 2048, %s53_s1, [#allocation7], %s1598_s18, %s1598_s18, %s1599_s19  }
  0x55   :  { %s1604_s20 = smov [#allocation11]   ;;  %s1521_s27 = scalar_lea.hbm %s1852_s7, 8192 }
  0x56   :  { %s80_s21 = sshll.u32 %s1604_s20, 4  ;;  %p1522_p12 = scmp.ne.s32.totalorder %s1852_s7, %s1521_s27  ;;  %s81_s21 = int_to_ptr.vmem [resolvable:$true] %s80_s21 }
  0x57   :  { %p1525_p13 = scmp.lt.u32.totalorder %s1521_s27, %s1852_s7 }
  0x59   :  { %p1527_p0 = pnand %p1525_p13, %p1522_p12 }
  0x5b   :  { %1530 = shalt.err (!%p1527_p0)
}
  0x5c   :  { %s1531_s30 = scalar_lea.vmem %s81_s21, 8192  ;;  %p1536_p2 = scmp.lt.s32.totalorder %s81_s21, %s81_s21 }
  0x5d   :  { %p1532_p1 = scmp.ne.s32.totalorder %s81_s21, %s1531_s30  ;;  %p1537_p3 = scmp.lt.s32.totalorder %s1531_s30, %s1531_s30 }
  0x5f   :  { %p1538_p4 = por %p1537_p3, %p1536_p2 }
  0x61   :  { %p1539_p5 = pnand %p1538_p4, %p1532_p1 }
  0x63   :  { %1542 = shalt.err (!%p1539_p5)
}
  0x64   :  { %s1605_s3 = smov 256   ;;  %s1606_s1 = smov 16  }
  0x65   :  { %86 = dma.hbm_to_vmem [thread:$0]  %s1852_s7, 8192, %s81_s21, [#allocation10], %s1605_s3, %s1605_s3, %s1606_s1  }
  0x66   :  { %s1607_s14 = smov [#allocation14]   ;;  %s1543_s0 = scalar_lea.hbm %s1856_s11, 2048 }
  0x67   :  { %s108_s16 = sshll.u32 %s1607_s14, 4  ;;  %p1544_p6 = scmp.ne.s32.totalorder %s1856_s11, %s1543_s0  ;;  %s109_s16 = int_to_ptr.vmem [resolvable:$true] %s108_s16 }
  0x68   :  { %p1547_p7 = scmp.lt.u32.totalorder %s1543_s0, %s1856_s11 }
  0x6a   :  { %p1549_p8 = pnand %p1547_p7, %p1544_p6 }
  0x6c   :  { %1552 = shalt.err (!%p1549_p8)
}
  0x6d   :  { %s1553_s27 = scalar_lea.vmem %s109_s16, 2048  ;;  %p1558_p10 = scmp.lt.s32.totalorder %s109_s16, %s109_s16 }
  0x6e   :  { %p1554_p9 = scmp.ne.s32.totalorder %s109_s16, %s1553_s27  ;;  %p1559_p11 = scmp.lt.s32.totalorder %s1553_s27, %s1553_s27 }
  0x70   :  { %p1560_p12 = por %p1559_p11, %p1558_p10 }
  0x72   :  { %p1561_p13 = pnand %p1560_p12, %p1554_p9 }
  0x74   :  { %1564 = shalt.err (!%p1561_p13)
}
  0x75   :  { %114 = dma.hbm_to_vmem [thread:$0]  %s1856_s11, 2048, %s109_s16, [#allocation13], %s1598_s18, %s1598_s18, %s1599_s19  }
  0x76   :  { %1587 = dma.done.wait [#allocation4], 32  }
  0x77   :  { %1588 = vsyncadd [#allocation4], 4294967264 }
  0x78   :  { %1589 = dma.done.wait [#allocation7], 2304  }
  0x79   :  { %1590 = vsyncadd [#allocation7], 4294964992 }
  0x7a   :  { %1591 = dma.done.wait [#allocation10], 10240  }
  0x7b   :  { %1592 = vsyncadd [#allocation10], 4294957056 }
  0x7c   :  { %1593 = dma.done.wait [#allocation13], 10240  }
  0x7d   :  { %1594 = vsyncadd [#allocation13], 4294957056  ;;  %v1608_v0 = vmov 0.0|0.0   ;;  %vm1609_vm0 = vmmov 0   ;;  %v1610_v1 = vmov 0.0   ;;  %v139_v2 = vld [vmem:[#allocation6] sm:$0xff] }
  0x7e   :  { %1189 = vmatprep.subr.bf16.mxu0 %v1608_v0  ;;  %1081 = vmatprep.mubr.msk.f32.mxu0 %vm1609_vm0, %v1610_v1  ;;  %v140_v3 = vld [vmem:[#allocation6 + $0x8] sm:$0xff]  ;;  %v223_v5 = vld [vmem:[#allocation8] sm:$0xff]  ;;  %v224_v6 = vld [vmem:[#allocation8 + $0x8] sm:$0xff]  ;;  %vm148_vm1 = vcmask 130048   ;;  %s1612_s3 = smov [#allocation15]  }
  0x7f   :  { %1192 = vmatprep.subr.bf16.mxu1 %v1608_v0  ;;  %1116 = vmatprep.mubr.msk.f32.mxu1 %vm1609_vm0, %v1610_v1  ;;  %v1190_v4 = vpack.c.bf16 %v140_v3, %v139_v2  ;;  %v225_v7 = vld [vmem:[#allocation8 + $0x10] sm:$0xff]  ;;  %v1193_v8 = vpack.c.bf16 %v224_v6, %v223_v5  ;;  %v226_v9 = vld [vmem:[#allocation8 + $0x18] sm:$0xff]  ;;  %v138_v10 = vld [vmem:[#allocation3] sm:$0x3]  ;;  %s933_s1 = sshll.u32 %s1612_s3, 4  ;;  %s934_s1 = int_to_ptr.vmem [resolvable:$true] %s933_s1 }
  0x80   :  { %v1196_v11 = vpack.c.bf16 %v226_v9, %v225_v7  ;;  %v227_v12 = vld [vmem:[#allocation8 + $0x20] sm:$0xff]  ;;  %v228_v13 = vld [vmem:[#allocation8 + $0x28] sm:$0xff]  ;;  %v229_v15 = vld [vmem:[#allocation8 + $0x30] sm:$0xff]  ;;  %p1570_p1 = scmp.lt.s32.totalorder %s934_s1, %s934_s1 }
  0x81   :  { %1191 = vmatpush3.bf16.msra.mxu0 %v1190_v4  ;;  %1194 = vmatpush3.bf16.msra.mxu1 %v1193_v8  ;;  %v1199_v14 = vpack.c.bf16 %v228_v13, %v227_v12  ;;  %v230_v16 = vld [vmem:[#allocation8 + $0x38] sm:$0xff]  ;;  %v231_v18 = vld [vmem:[#allocation8 + $0x40] sm:$0xff]  ;;  %v232_v19 = vld [vmem:[#allocation8 + $0x48] sm:$0xff] }
  0x82   :  { %1216 = vmatprep.subr.bf16.mxu0 %v1608_v0  ;;  %1195 = vmatprep.subr.bf16.mxu1 %v1608_v0  ;;  %v1202_v17 = vpack.c.bf16 %v230_v16, %v229_v15  ;;  %v1205_v20 = vpack.c.bf16 %v232_v19, %v231_v18  ;;  %v233_v21 = vld [vmem:[#allocation8 + $0x50] sm:$0xff]  ;;  %v234_v22 = vld [vmem:[#allocation8 + $0x58] sm:$0xff]  ;;  %v235_v24 = vld [vmem:[#allocation8 + $0x60] sm:$0xff] }
  0x83   :  { %v1208_v23 = vpack.c.bf16 %v234_v22, %v233_v21  ;;  %v236_v25 = vld [vmem:[#allocation8 + $0x68] sm:$0xff]  ;;  %v237_v27 = vld [vmem:[#allocation8 + $0x70] sm:$0xff]  ;;  %v238_v28 = vld [vmem:[#allocation8 + $0x78] sm:$0xff] }
  0x84   :  { %1082 = vmatmul.mubr.msk.f32.vlgmr.msra.gmra.mrb[0].mxu0 %vm148_vm1, %v138_v10  ;;  %v1211_v26 = vpack.c.bf16 %v236_v25, %v235_v24  ;;  %v1214_v29 = vpack.c.bf16 %v238_v28, %v237_v27  ;;  %v317_v30 = vld [vmem:[#allocation9] sm:$0xff]  ;;  %v318_v31 = vld [vmem:[#allocation9 + $0x8] sm:$0xff]  ;;  %v319_v32 = vld [vmem:[#allocation9 + $0x10] sm:$0xff] }
  0x85   :  { %1151 = vmatprep.mubr.msk.f32.mxu0 %vm1609_vm0, %v1610_v1  ;;  %1197 = vmatpush3.bf16.msra.mxu1 %v1196_v11  ;;  %v1217_v33 = vpack.c.bf16 %v318_v31, %v317_v30  ;;  %v320_v34 = vld [vmem:[#allocation9 + $0x18] sm:$0xff]  ;;  %v321_v36 = vld [vmem:[#allocation9 + $0x20] sm:$0xff]  ;;  %v322_v37 = vld [vmem:[#allocation9 + $0x28] sm:$0xff] }
  0x86   :  { %1198 = vmatprep.subr.bf16.mxu1 %v1608_v0  ;;  %v1220_v35 = vpack.c.bf16 %v320_v34, %v319_v32  ;;  %v1223_v38 = vpack.c.bf16 %v322_v37, %v321_v36  ;;  %v323_v39 = vld [vmem:[#allocation9 + $0x30] sm:$0xff]  ;;  %v324_v40 = vld [vmem:[#allocation9 + $0x38] sm:$0xff]  ;;  %v325_v42 = vld [vmem:[#allocation9 + $0x40] sm:$0xff] }
  0x87   :  { %1218 = vmatpush3.bf16.msra.mxu0 %v1217_v33  ;;  %v1226_v41 = vpack.c.bf16 %v324_v40, %v323_v39  ;;  %v326_v43 = vld [vmem:[#allocation9 + $0x48] sm:$0xff]  ;;  %v327_v45 = vld [vmem:[#allocation9 + $0x50] sm:$0xff]  ;;  %v328_v46 = vld [vmem:[#allocation9 + $0x58] sm:$0xff] }
  0x88   :  { %1219 = vmatprep.subr.bf16.mxu0 %v1608_v0  ;;  %v1229_v44 = vpack.c.bf16 %v326_v43, %v325_v42  ;;  %v1232_v47 = vpack.c.bf16 %v328_v46, %v327_v45  ;;  %v329_v48 = vld [vmem:[#allocation9 + $0x60] sm:$0xff]  ;;  %v330_v49 = vld [vmem:[#allocation9 + $0x68] sm:$0xff]  ;;  %v331_v56 = vld [vmem:[#allocation9 + $0x70] sm:$0xff] }
  0x89   :  { %1200 = vmatpush3.bf16.msra.mxu1 %v1199_v14  ;;  %v1235_v50 = vpack.c.bf16 %v330_v49, %v329_v48  ;;  %v945_v51 = vld [vmem:[%s1847_s2] ss:$0 sm:$0xff]  ;;  %v332_v57 = vld [vmem:[#allocation9 + $0x78] sm:$0xff]  ;;  %v418_v59 = vld [vmem:[#allocation11 + $0x8] sm:$0xff] }
  0x8a   :  { %1201 = vmatprep.subr.bf16.mxu1 %v1608_v0  ;;  %v1238_v58 = vpack.c.bf16 %v332_v57, %v331_v56  ;;  %v420_v60 = vld [vmem:[#allocation11 + $0x18] sm:$0xff]  ;;  %v417_v61 = vld [vmem:[#allocation11] sm:$0xff]  ;;  %v419_v63 = vld [vmem:[#allocation11 + $0x10] sm:$0xff] }
  0x8b   :  { %1221 = vmatpush3.bf16.msra.mxu0 %v1220_v35  ;;  %v1240_v62 = vpack.c.bf16 %v420_v60, %v418_v59  ;;  %v422_v2 = vld [vmem:[#allocation11 + $0x28] sm:$0xff]  ;;  %v424_v3 = vld [vmem:[#allocation11 + $0x38] sm:$0xff]  ;;  %v1242_v4 = vpack.c.bf16 %v419_v63, %v417_v61  ;;  %v421_v6 = vld [vmem:[#allocation11 + $0x20] sm:$0xff] }
  0x8c   :  { %1222 = vmatprep.subr.bf16.mxu0 %v1608_v0  ;;  %v1244_v5 = vpack.c.bf16 %v424_v3, %v422_v2  ;;  %v423_v7 = vld [vmem:[#allocation11 + $0x30] sm:$0xff]  ;;  %v426_v8 = vld [vmem:[#allocation11 + $0x48] sm:$0xff]  ;;  %v428_v9 = vld [vmem:[#allocation11 + $0x58] sm:$0xff] }
  0x8d   :  { %1203 = vmatpush3.bf16.msra.mxu1 %v1202_v17  ;;  %v1246_v10 = vpack.c.bf16 %v423_v7, %v421_v6  ;;  %v1248_v11 = vpack.c.bf16 %v428_v9, %v426_v8  ;;  %v425_v12 = vld [vmem:[#allocation11 + $0x40] sm:$0xff]  ;;  %v427_v13 = vld [vmem:[#allocation11 + $0x50] sm:$0xff]  ;;  %v430_v14 = vld [vmem:[#allocation11 + $0x68] sm:$0xff] }
  0x8e   :  { %1204 = vmatprep.subr.bf16.mxu1 %v1608_v0  ;;  %v432_v15 = vld [vmem:[#allocation11 + $0x78] sm:$0xff]  ;;  %v1250_v16 = vpack.c.bf16 %v427_v13, %v425_v12  ;;  %v429_v18 = vld [vmem:[#allocation11 + $0x60] sm:$0xff]  ;;  %v431_v19 = vld [vmem:[#allocation11 + $0x70] sm:$0xff] }
  0x8f   :  { %1224 = vmatpush3.bf16.msra.mxu0 %v1223_v38  ;;  %v1252_v17 = vpack.c.bf16 %v432_v15, %v430_v14  ;;  %v436_v21 = vld [vmem:[#allocation11 + $0x98] sm:$0xff]  ;;  %v1254_v22 = vpack.c.bf16 %v431_v19, %v429_v18  ;;  %v433_v24 = vld [vmem:[#allocation11 + $0x80] sm:$0xff]  ;;  %v435_v25 = vld [vmem:[#allocation11 + $0x90] sm:$0xff] }
  0x90   :  { %1225 = vmatprep.subr.bf16.mxu0 %v1608_v0  ;;  %v440_v27 = vld [vmem:[#allocation11 + $0xb8] sm:$0xff]  ;;  %v1258_v28 = vpack.c.bf16 %v435_v25, %v433_v24  ;;  %v437_v30 = vld [vmem:[#allocation11 + $0xa0] sm:$0xff]  ;;  %v439_v31 = vld [vmem:[#allocation11 + $0xb0] sm:$0xff] }
  0x91   :  { %1206 = vmatpush3.bf16.msra.mxu1 %v1205_v20  ;;  %v434_v20 = vld [vmem:[#allocation11 + $0x88] sm:$0xff]  ;;  %v444_v33 = vld [vmem:[#allocation11 + $0xd8] sm:$0xff]  ;;  %v1262_v34 = vpack.c.bf16 %v439_v31, %v437_v30  ;;  %v441_v36 = vld [vmem:[#allocation11 + $0xc0] sm:$0xff] }
  0x92   :  { %1207 = vmatprep.subr.bf16.mxu1 %v1608_v0  ;;  %v442_v32 = vld [vmem:[#allocation11 + $0xc8] sm:$0xff]  ;;  %v443_v37 = vld [vmem:[#allocation11 + $0xd0] sm:$0xff]  ;;  %v448_v39 = vld [vmem:[#allocation11 + $0xf8] sm:$0xff] }
  0x93   :  { %1227 = vmatpush3.bf16.msra.mxu0 %v1226_v41  ;;  %v1264_v35 = vpack.c.bf16 %v444_v33, %v442_v32  ;;  %v446_v38 = vld [vmem:[#allocation11 + $0xe8] sm:$0xff]  ;;  %v1266_v40 = vpack.c.bf16 %v443_v37, %v441_v36  ;;  %v445_v42 = vld [vmem:[#allocation11 + $0xe0] sm:$0xff]  ;;  %v447_v43 = vld [vmem:[#allocation11 + $0xf0] sm:$0xff] }
  0x94   :  { %1228 = vmatprep.subr.bf16.mxu0 %v1608_v0  ;;  %v1268_v41 = vpack.c.bf16 %v448_v39, %v446_v38  ;;  %v452_v45 = vld [vmem:[#allocation11 + $0x118] sm:$0xff]  ;;  %v1270_v46 = vpack.c.bf16 %v447_v43, %v445_v42  ;;  %v449_v48 = vld [vmem:[#allocation11 + $0x100] sm:$0xff]  ;;  %v451_v49 = vld [vmem:[#allocation11 + $0x110] sm:$0xff] }
  0x95   :  { %1209 = vmatpush3.bf16.msra.mxu1 %v1208_v23  ;;  %v1256_v23 = vpack.c.bf16 %v436_v21, %v434_v20  ;;  %v947_v57 = vld [vmem:[%s1849_s4] ss:$0 sm:$0xff]  ;;  %v458_v61 = vld [vmem:[#allocation11 + $0x148] sm:$0xff]  ;;  %v459_v3 = vld [vmem:[#allocation11 + $0x150] sm:$0xff] }
  0x96   :  { %1210 = vmatprep.subr.bf16.mxu1 %v1608_v0  ;;  %v457_v2 = vld [vmem:[#allocation11 + $0x140] sm:$0xff]  ;;  %v464_v6 = vld [vmem:[#allocation11 + $0x178] sm:$0xff]  ;;  %v463_v9 = vld [vmem:[#allocation11 + $0x170] sm:$0xff] }
  0x97   :  { %1230 = vmatpush3.bf16.msra.mxu0 %v1229_v44  ;;  %v450_v44 = vld [vmem:[#allocation11 + $0x108] sm:$0xff]  ;;  %v461_v8 = vld [vmem:[#allocation11 + $0x160] sm:$0xff]  ;;  %v468_v12 = vld [vmem:[#allocation11 + $0x198] sm:$0xff] }
  0x98   :  { %1231 = vmatprep.subr.bf16.mxu0 %v1608_v0  ;;  %v465_v14 = vld [vmem:[#allocation11 + $0x180] sm:$0xff]  ;;  %v467_v15 = vld [vmem:[#allocation11 + $0x190] sm:$0xff]  ;;  %v472_v18 = vld [vmem:[#allocation11 + $0x1b8] sm:$0xff] }
  0x99   :  { %1212 = vmatpush3.bf16.msra.mxu1 %v1211_v26  ;;  %v438_v26 = vld [vmem:[#allocation11 + $0xa8] sm:$0xff]  ;;  %v469_v20 = vld [vmem:[#allocation11 + $0x1a0] sm:$0xff]  ;;  %v471_v21 = vld [vmem:[#allocation11 + $0x1b0] sm:$0xff] }
  0x9a   :  { %1213 = vmatprep.subr.bf16.mxu1 %v1608_v0  ;;  %v476_v24 = vld [vmem:[#allocation11 + $0x1d8] sm:$0xff]  ;;  %v473_v25 = vld [vmem:[#allocation11 + $0x1c0] sm:$0xff]  ;;  %v479_v33 = vld [vmem:[#allocation11 + $0x1f0] sm:$0xff] }
  0x9b   :  { %1233 = vmatpush3.bf16.msra.mxu0 %v1232_v47  ;;  %v1272_v47 = vpack.c.bf16 %v452_v45, %v450_v44  ;;  %v477_v32 = vld [vmem:[#allocation11 + $0x1e0] sm:$0xff]  ;;  %v615_v36 = vld [vmem:[#allocation12 + $0x88] sm:$0xff] }
  0x9c   :  { %1234 = vmatprep.subr.bf16.mxu0 %v1608_v0  ;;  %v598_v37 = vld [vmem:[#allocation12] sm:$0xff]  ;;  %v599_v39 = vld [vmem:[#allocation12 + $0x8] sm:$0xff] }
  0x9d   :  { %1215 = vmatpush3.bf16.msra.mxu1 %v1214_v29  ;;  %v1260_v29 = vpack.c.bf16 %v440_v27, %v438_v26  ;;  %v475_v27 = vld [vmem:[#allocation11 + $0x1d0] sm:$0xff] }
  0x9e   :  { %1241 = vmatprep.subr.bf16.mxu1 %v1240_v62  ;;  %v460_v62 = vld [vmem:[#allocation11 + $0x158] sm:$0xff]  ;;  %v1298_v30 = vpack.c.bf16 %v475_v27, %v473_v25 }
  0x9f   :  { %1236 = vmatpush3.bf16.msra.mxu0 %v1235_v50  ;;  %v454_v50 = vld [vmem:[#allocation11 + $0x128] sm:$0xff]  ;;  %v1280_v63 = vpack.c.bf16 %v460_v62, %v458_v61  ;;  %v602_v61 = vld [vmem:[#allocation12 + $0x20] sm:$0xff]  ;;  %v629_v25 = vld [vmem:[#allocation12 + $0xf8] sm:$0xff] }
  0xa0   :  { %1237 = vmatprep.subr.bf16.mxu0 %v1608_v0  ;;  %v603_v62 = vld [vmem:[#allocation12 + $0x28] sm:$0xff] }
  0xa3   :  { %1239 = vmatpush3.bf16.msra.mxu0 %v1238_v58 }
 0x157   :  { %v218_v52 = vpop.f32.mrb[0].mxu0 }
 0x158   :  { %v219_v53 = vadd.f32 %v945_v51, %v218_v52  ;;  %v1083_v54 = vpop.f32.mrb[1].mxu0  ;;  %v456_v51 = vld [vmem:[#allocation11 + $0x138] sm:$0xff]  ;;  %v1274_v52 = vpack.c.bf16 %v451_v49, %v449_v48 }
 0x159   :  { %v453_v54 = vld [vmem:[#allocation11 + $0x120] sm:$0xff] }
 0x15a   :  { %v222_v55 = vmax.f32 %v219_v53, 0.0  ;;  %v1276_v53 = vpack.c.bf16 %v456_v51, %v454_v50 }
 0x15c   :  { %1117 = vmatmul.mubr.f32.vlgmr.msra.gmra.mrb[0].mxu1 %v222_v55  ;;  %v455_v55 = vld [vmem:[#allocation11 + $0x130] sm:$0xff] }
 0x15d   :  { %1243 = vmatpush1.bf16.msra.mxu1 %v1242_v4  ;;  %v1278_v56 = vpack.c.bf16 %v455_v55, %v453_v54  ;;  %v1282_v4 = vpack.c.bf16 %v459_v3, %v457_v2  ;;  %v600_v55 = vld [vmem:[#allocation12 + $0x10] sm:$0xff]  ;;  %v621_v3 = vld [vmem:[#allocation12 + $0xb8] sm:$0xff] }
 0x15e   :  { %1245 = vmatprep.subr.bf16.mxu1 %v1244_v5  ;;  %v462_v5 = vld [vmem:[#allocation11 + $0x168] sm:$0xff]  ;;  %v620_v2 = vld [vmem:[#allocation12 + $0xb0] sm:$0xff] }
 0x15f   :  { %v1284_v7 = vpack.c.bf16 %v464_v6, %v462_v5  ;;  %v605_v5 = vld [vmem:[#allocation12 + $0x38] sm:$0xff] }
 0x161   :  { %1247 = vmatpush1.bf16.msra.mxu1 %v1246_v10  ;;  %v1286_v10 = vpack.c.bf16 %v463_v9, %v461_v8  ;;  %v623_v8 = vld [vmem:[#allocation12 + $0xc8] sm:$0xff] }
 0x162   :  { %1249 = vmatprep.subr.bf16.mxu1 %v1248_v11  ;;  %v466_v11 = vld [vmem:[#allocation11 + $0x188] sm:$0xff] }
 0x163   :  { %v1288_v13 = vpack.c.bf16 %v468_v12, %v466_v11  ;;  %v607_v11 = vld [vmem:[#allocation12 + $0x48] sm:$0xff] }
 0x165   :  { %1251 = vmatpush1.bf16.msra.mxu1 %v1250_v16  ;;  %v1290_v16 = vpack.c.bf16 %v467_v15, %v465_v14  ;;  %v625_v14 = vld [vmem:[#allocation12 + $0xd8] sm:$0xff] }
 0x166   :  { %1253 = vmatprep.subr.bf16.mxu1 %v1252_v17  ;;  %v470_v17 = vld [vmem:[#allocation11 + $0x1a8] sm:$0xff] }
 0x167   :  { %v1292_v19 = vpack.c.bf16 %v472_v18, %v470_v17  ;;  %v609_v17 = vld [vmem:[#allocation12 + $0x58] sm:$0xff] }
 0x169   :  { %1255 = vmatpush1.bf16.msra.mxu1 %v1254_v22  ;;  %v1294_v22 = vpack.c.bf16 %v471_v21, %v469_v20  ;;  %v627_v20 = vld [vmem:[#allocation12 + $0xe8] sm:$0xff]  ;;  %v610_v21 = vld [vmem:[#allocation12 + $0x60] sm:$0xff] }
 0x16a   :  { %1257 = vmatprep.subr.bf16.mxu1 %v1256_v23  ;;  %v474_v23 = vld [vmem:[#allocation11 + $0x1c8] sm:$0xff] }
 0x16b   :  { %v1296_v26 = vpack.c.bf16 %v476_v24, %v474_v23  ;;  %v611_v23 = vld [vmem:[#allocation12 + $0x68] sm:$0xff]  ;;  %v628_v24 = vld [vmem:[#allocation12 + $0xf0] sm:$0xff] }
 0x16c   :  { %v1332_v27 = vpack.c.bf16 %v629_v25, %v628_v24  ;;  %v655_v24 = vld [vmem:[#allocation12 + $0x1c8] sm:$0xff] }
 0x16d   :  { %1259 = vmatpush1.bf16.msra.mxu1 %v1258_v28  ;;  %v478_v28 = vld [vmem:[#allocation11 + $0x1e8] sm:$0xff] }
 0x16e   :  { %1261 = vmatprep.subr.bf16.mxu1 %v1260_v29  ;;  %v480_v29 = vld [vmem:[#allocation11 + $0x1f8] sm:$0xff] }
 0x16f   :  { %v1300_v31 = vpack.c.bf16 %v480_v29, %v478_v28  ;;  %v612_v28 = vld [vmem:[#allocation12 + $0x70] sm:$0xff]  ;;  %v613_v29 = vld [vmem:[#allocation12 + $0x78] sm:$0xff] }
 0x171   :  { %1263 = vmatpush1.bf16.msra.mxu1 %v1262_v34  ;;  %v1302_v34 = vpack.c.bf16 %v479_v33, %v477_v32  ;;  %v647_v32 = vld [vmem:[#allocation12 + $0x188] sm:$0xff] }
 0x172   :  { %1265 = vmatprep.subr.bf16.mxu1 %v1264_v35  ;;  %v614_v35 = vld [vmem:[#allocation12 + $0x80] sm:$0xff] }
 0x173   :  { %v1304_v38 = vpack.c.bf16 %v615_v36, %v614_v35 }
 0x175   :  { %1267 = vmatpush1.bf16.msra.mxu1 %v1266_v40  ;;  %v1306_v40 = vpack.c.bf16 %v599_v39, %v598_v37  ;;  %1305 = vmatprep.subr.bf16.mxu0 %v1304_v38  ;;  %v481_v37 = vld [vmem:[%s1853_s8] sm:$0x3] }
 0x176   :  { %1269 = vmatprep.subr.bf16.mxu1 %v1268_v41  ;;  %v948_v41 = vld [vmem:[%s1851_s6] ss:$0 sm:$0xff] }
 0x179   :  { %1271 = vmatpush1.bf16.msra.mxu1 %v1270_v46 }
 0x17a   :  { %1273 = vmatprep.subr.bf16.mxu1 %v1272_v47 }
 0x17d   :  { %1275 = vmatpush1.bf16.msra.mxu1 %v1274_v52  ;;  %v616_v52 = vld [vmem:[#allocation12 + $0x90] sm:$0xff] }
 0x17e   :  { %1277 = vmatprep.subr.bf16.mxu1 %v1276_v53  ;;  %v617_v53 = vld [vmem:[#allocation12 + $0x98] sm:$0xff] }
 0x17f   :  { %v1308_v54 = vpack.c.bf16 %v617_v53, %v616_v52 }
 0x181   :  { %1279 = vmatpush1.bf16.msra.mxu1 %v1278_v56  ;;  %v601_v56 = vld [vmem:[#allocation12 + $0x18] sm:$0xff] }
 0x182   :  { %1281 = vmatprep.subr.bf16.mxu1 %v1280_v63  ;;  %v1314_v63 = vpack.c.bf16 %v603_v62, %v602_v61  ;;  %v630_v61 = vld [vmem:[#allocation12 + $0x100] sm:$0xff]  ;;  %v631_v62 = vld [vmem:[#allocation12 + $0x108] sm:$0xff] }
 0x185   :  { %1283 = vmatpush1.bf16.msra.mxu1 %v1282_v4  ;;  %v1316_v4 = vpack.c.bf16 %v621_v3, %v620_v2  ;;  %v648_v3 = vld [vmem:[#allocation12 + $0x190] sm:$0xff] }
 0x186   :  { %1285 = vmatprep.subr.bf16.mxu1 %v1284_v7  ;;  %v622_v7 = vld [vmem:[#allocation12 + $0xc0] sm:$0xff] }
 0x187   :  { %v1320_v9 = vpack.c.bf16 %v623_v8, %v622_v7  ;;  %v632_v8 = vld [vmem:[#allocation12 + $0x110] sm:$0xff] }
 0x189   :  { %1287 = vmatpush1.bf16.msra.mxu1 %v1286_v10  ;;  %v606_v10 = vld [vmem:[#allocation12 + $0x40] sm:$0xff] }
 0x18a   :  { %1289 = vmatprep.subr.bf16.mxu1 %v1288_v13  ;;  %v1322_v12 = vpack.c.bf16 %v607_v11, %v606_v10  ;;  %v624_v13 = vld [vmem:[#allocation12 + $0xd0] sm:$0xff]  ;;  %v650_v11 = vld [vmem:[#allocation12 + $0x1a0] sm:$0xff] }
 0x18b   :  { %v1324_v15 = vpack.c.bf16 %v625_v14, %v624_v13 }
 0x18d   :  { %1291 = vmatpush1.bf16.msra.mxu1 %v1290_v16  ;;  %v608_v16 = vld [vmem:[#allocation12 + $0x50] sm:$0xff] }
 0x18e   :  { %1293 = vmatprep.subr.bf16.mxu1 %v1292_v19  ;;  %v1326_v18 = vpack.c.bf16 %v609_v17, %v608_v16  ;;  %v626_v19 = vld [vmem:[#allocation12 + $0xe0] sm:$0xff]  ;;  %v635_v16 = vld [vmem:[#allocation12 + $0x128] sm:$0xff]  ;;  %v652_v17 = vld [vmem:[#allocation12 + $0x1b0] sm:$0xff] }
 0x191   :  { %1295 = vmatpush1.bf16.msra.mxu1 %v1294_v22  ;;  %v1328_v22 = vpack.c.bf16 %v627_v20, %v626_v19 }
 0x192   :  { %1297 = vmatprep.subr.bf16.mxu1 %v1296_v26  ;;  %v1330_v26 = vpack.c.bf16 %v611_v23, %v610_v21  ;;  %v636_v21 = vld [vmem:[#allocation12 + $0x130] sm:$0xff]  ;;  %v654_v23 = vld [vmem:[#allocation12 + $0x1c0] sm:$0xff] }
 0x195   :  { %1299 = vmatpush1.bf16.msra.mxu1 %v1298_v30  ;;  %v1334_v30 = vpack.c.bf16 %v613_v29, %v612_v28  ;;  %v639_v28 = vld [vmem:[#allocation12 + $0x148] sm:$0xff]  ;;  %v656_v29 = vld [vmem:[#allocation12 + $0x1d0] sm:$0xff] }
 0x196   :  { %1301 = vmatprep.subr.bf16.mxu1 %v1300_v31  ;;  %v646_v31 = vld [vmem:[#allocation12 + $0x180] sm:$0xff] }
 0x197   :  { %v1336_v33 = vpack.c.bf16 %v647_v32, %v646_v31 }
 0x199   :  { %1303 = vmatpush1.bf16.msra.mxu1 %v1302_v34  ;;  %v483_v34 = vlaneseq }
 0x19a   :  { %1368 = vmatprep.subr.bf16.mxu1 %v1608_v0 }
 0x19b   :  { %v484_v35 = vshrl.u32 %v483_v34, 7  ;;  %v641_v34 = vld [vmem:[#allocation12 + $0x158] sm:$0xff] }
 0x19d   :  { %v485_v36 = vsub.s32 0, %v484_v35  ;;  %v489_v38 = vsub.s32 1, %v484_v35 }
 0x19f   :  { %v486_v39 = vrot.slane %v481_v37, %v485_v36  ;;  %v659_v36 = vld [vmem:[#allocation12 + $0x1e8] sm:$0xff] }
 0x22f   :  { %v312_v58 = vpop.f32.mrb[0].mxu1 }
 0x230   :  { %v313_v59 = vadd.f32 %v947_v57, %v312_v58  ;;  %v1118_v60 = vpop.f32.mrb[1].mxu1  ;;  %v1310_v57 = vpack.c.bf16 %v601_v56, %v600_v55  ;;  %v618_v58 = vld [vmem:[#allocation12 + $0xa0] sm:$0xff]  ;;  %v1611_v55 = vmov 1983009808  }
 0x231   :  { %v672_v56 = vunpack.c.l.s4 %v1611_v55  ;;  %v837_v55 = vld [vmem:[#allocation14 + $0x28] sm:$0xff] }
 0x232   :  { %316 = vst [vmem:[#allocation2] sm:$0x3] %v313_v59  ;;  %1152 = vmatmul.mubr.f32.vlgmr.msra.gmra.mrb[2].mxu0 %v313_v59  ;;  %v619_v59 = vld [vmem:[#allocation12 + $0xa8] sm:$0xff] }
 0x233   :  { %1307 = vmatpush3.bf16.msra.mxu0 %v1306_v40  ;;  %v1312_v60 = vpack.c.bf16 %v619_v59, %v618_v58  ;;  %v490_v40 = vrot.slane %v481_v37, %v489_v38  ;;  %v673_v58 = vunpack.c.0.s8 %v672_v56 }
 0x234   :  { %1309 = vmatprep.subr.bf16.mxu0 %v1308_v54 }
 0x235   :  { %v676_v59 = vsub.s32 %v673_v58, %v484_v35  ;;  %v658_v35 = vld [vmem:[#allocation12 + $0x1e0] sm:$0xff]  ;;  %v839_v58 = vld [vmem:[#allocation14 + $0x38] sm:$0xff] }
 0x236   :  { %v1360_v38 = vpack.c.bf16 %v659_v36, %v658_v35 }
 0x237   :  { %1311 = vmatpush3.bf16.msra.mxu0 %v1310_v57 }
 0x238   :  { %1313 = vmatprep.subr.bf16.mxu0 %v1312_v60 }
 0x23b   :  { %1315 = vmatpush3.bf16.msra.mxu0 %v1314_v63 }
 0x23c   :  { %1317 = vmatprep.subr.bf16.mxu0 %v1316_v4  ;;  %v649_v4 = vld [vmem:[#allocation12 + $0x198] sm:$0xff] }
 0x23d   :  { %v1340_v7 = vpack.c.bf16 %v649_v4, %v648_v3  ;;  %v844_v4 = vld [vmem:[#allocation14 + $0x60] sm:$0xff] }
 0x305   :  { %v406_v42 = vpop.f32.mrb[2].mxu0 }
 0x306   :  { %v407_v43 = vadd.f32 %v948_v41, %v406_v42  ;;  %v1153_v44 = vpop.f32.mrb[3].mxu0 }
 0x308   :  { %v410_v45 = vadd.f32 3.0, %v407_v43 }
 0x30a   :  { %v411_v46 = vmax.f32 %v410_v45, 0.0 }
 0x30c   :  { %v412_v47 = vmin.f32 %v411_v46, 6.0 }
 0x30e   :  { %v413_v48 = vmul.f32 %v412_v47, %v407_v43 }
 0x310   :  { %v414_v49 = vmul.f32 0.16666667, %v413_v48 }
 0x312   :  { %415 = vst [vmem:[#allocation2 + $0x2] sm:$0x3] %v414_v49 }
 0x319   :  { %v949_v50 = vld.sshfl [vmem:[#allocation2] sm:$0x33 pattern:$0x76325410] }
 0x31a   :  { %v501_v51 = vcombine.high %v949_v50, %v949_v50 }
 0x31c   :  { %568 = vmatprep.mubr.f32.mxu1 %v501_v51 }
 0x31d   :  { %569 = vmatmul.mubr.f32.vlgmr.msra.gmra.mrb[2].mxu1 %v949_v50 }
 0x31e   :  { %1186 = vmatprep.mubr.msk.f32.mxu1 %vm1609_vm0, %v1610_v1  ;;  %v604_v1 = vld [vmem:[#allocation12 + $0x30] sm:$0xff] }
 0x31f   :  { %v1318_v6 = vpack.c.bf16 %v605_v5, %v604_v1  ;;  %v1338_v5 = vpack.c.bf16 %v631_v62, %v630_v61  ;;  %v841_v61 = vld [vmem:[#allocation14 + $0x48] sm:$0xff] }
 0x321   :  { %1319 = vmatpush3.bf16.msra.mxu0 %v1318_v6 }
 0x322   :  { %1321 = vmatprep.subr.bf16.mxu0 %v1320_v9  ;;  %v633_v9 = vld [vmem:[#allocation12 + $0x118] sm:$0xff] }
 0x323   :  { %v1342_v13 = vpack.c.bf16 %v633_v9, %v632_v8 }
 0x325   :  { %1323 = vmatpush3.bf16.msra.mxu0 %v1322_v12  ;;  %v651_v12 = vld [vmem:[#allocation12 + $0x1a8] sm:$0xff] }
 0x326   :  { %1325 = vmatprep.subr.bf16.mxu0 %v1324_v15  ;;  %v1344_v14 = vpack.c.bf16 %v651_v12, %v650_v11  ;;  %v634_v15 = vld [vmem:[#allocation12 + $0x120] sm:$0xff] }
 0x327   :  { %v1346_v19 = vpack.c.bf16 %v635_v16, %v634_v15  ;;  %v951_v12 = vld [vmem:[%s1855_s10] ss:$0 sm:$0xff]  ;;  %s1565_s10 = scalar_lea.vmem %s934_s1, 32 }
 0x328   :  { %p1566_p0 = scmp.ne.s32.totalorder %s934_s1, %s1565_s10  ;;  %p1571_p2 = scmp.lt.s32.totalorder %s1565_s10, %s1565_s10 }
 0x329   :  { %1327 = vmatpush3.bf16.msra.mxu0 %v1326_v18  ;;  %v653_v18 = vld [vmem:[#allocation12 + $0x1b8] sm:$0xff] }
 0x32a   :  { %1329 = vmatprep.subr.bf16.mxu0 %v1328_v22  ;;  %v1348_v20 = vpack.c.bf16 %v653_v18, %v652_v17  ;;  %v637_v22 = vld [vmem:[#allocation12 + $0x138] sm:$0xff]  ;;  %p1572_p3 = por %p1571_p2, %p1570_p1 }
 0x32b   :  { %v1350_v25 = vpack.c.bf16 %v637_v22, %v636_v21 }
 0x32c   :  { %p1573_p4 = pnand %p1572_p3, %p1566_p0 }
 0x32d   :  { %1331 = vmatpush3.bf16.msra.mxu0 %v1330_v26  ;;  %v1352_v26 = vpack.c.bf16 %v655_v24, %v654_v23 }
 0x32e   :  { %1333 = vmatprep.subr.bf16.mxu0 %v1332_v27  ;;  %v638_v27 = vld [vmem:[#allocation12 + $0x140] sm:$0xff] }
 0x32f   :  { %v1354_v31 = vpack.c.bf16 %v639_v28, %v638_v27 }
 0x331   :  { %1335 = vmatpush3.bf16.msra.mxu0 %v1334_v30  ;;  %v657_v30 = vld [vmem:[#allocation12 + $0x1d8] sm:$0xff] }
 0x332   :  { %1337 = vmatprep.subr.bf16.mxu0 %v1336_v33  ;;  %v1356_v32 = vpack.c.bf16 %v657_v30, %v656_v29  ;;  %v640_v33 = vld [vmem:[#allocation12 + $0x150] sm:$0xff] }
 0x333   :  { %v1358_v37 = vpack.c.bf16 %v641_v34, %v640_v33 }
 0x3f0   :  { %v570_v41 = vpop.f32.mrb[2].mxu1 }
 0x3f1   :  { %v571_v42 = vadd.f32 %v570_v41, %v486_v39  ;;  %v572_v43 = vpop.f32.mrb[3].mxu1  ;;  %v642_v39 = vld [vmem:[#allocation12 + $0x160] sm:$0xff]  ;;  %v660_v41 = vld [vmem:[#allocation12 + $0x1f0] sm:$0xff] }
 0x3f2   :  { %v573_v44 = vadd.f32 %v572_v43, %v490_v40  ;;  %v643_v40 = vld [vmem:[#allocation12 + $0x168] sm:$0xff] }
 0x3f3   :  { %v575_v45 = vadd.f32 3.0, %v571_v42  ;;  %v1362_v43 = vpack.c.bf16 %v643_v40, %v642_v39 }
 0x3f4   :  { %v576_v46 = vadd.f32 3.0, %v573_v44 }
 0x3f5   :  { %v577_v47 = vmax.f32 %v575_v45, 0.0  ;;  %v644_v45 = vld [vmem:[#allocation12 + $0x170] sm:$0xff] }
 0x3f6   :  { %v578_v48 = vmax.f32 %v576_v46, 0.0  ;;  %v645_v46 = vld [vmem:[#allocation12 + $0x178] sm:$0xff] }
 0x3f7   :  { %v579_v49 = vmin.f32 %v577_v47, 6.0  ;;  %v1366_v47 = vpack.c.bf16 %v645_v46, %v644_v45 }
 0x3f8   :  { %v580_v50 = vmin.f32 %v578_v48, 6.0  ;;  %v832_v48 = vld [vmem:[#allocation14] sm:$0xff] }
 0x3f9   :  { %v581_v51 = vmul.f32 %v579_v49, %v571_v42  ;;  %v661_v42 = vld [vmem:[#allocation12 + $0x1f8] sm:$0xff]  ;;  %v833_v49 = vld [vmem:[#allocation14 + $0x8] sm:$0xff] }
 0x3fa   :  { %v582_v52 = vmul.f32 %v580_v50, %v573_v44  ;;  %v1364_v44 = vpack.c.bf16 %v661_v42, %v660_v41  ;;  %v834_v50 = vld [vmem:[#allocation14 + $0x10] sm:$0xff] }
 0x3fb   :  { %v583_v53 = vmul.f32 0.16666667, %v581_v51  ;;  %v1369_v51 = vpack.c.bf16 %v833_v49, %v832_v48 }
 0x3fc   :  { %v584_v54 = vmul.f32 0.16666667, %v582_v52  ;;  %v835_v52 = vld [vmem:[#allocation14 + $0x18] sm:$0xff] }
 0x3fd   :  { %1370 = vmatpush3.bf16.msra.mxu1 %v1369_v51 }
 0x3fe   :  { %v587_v57 = vcombine.low %v583_v53, %v584_v54  ;;  %v1372_v53 = vpack.c.bf16 %v835_v52, %v834_v50  ;;  %1371 = vmatprep.subr.bf16.mxu1 %v1608_v0  ;;  %v836_v54 = vld [vmem:[#allocation14 + $0x20] sm:$0xff] }
 0x3ff   :  { %v1375_v56 = vpack.c.bf16 %v837_v55, %v836_v54 }
 0x400   :  { %950 = vst.sshfl [vmem:[#allocation2 + $0x4] sm:$0x33 pattern:$0x76325410] %v587_v57  ;;  %v838_v57 = vld [vmem:[#allocation14 + $0x30] sm:$0xff] }
 0x401   :  { %1373 = vmatpush3.bf16.msra.mxu1 %v1372_v53 }
 0x402   :  { %1374 = vmatprep.subr.bf16.mxu1 %v1608_v0 }
 0x405   :  { %1376 = vmatpush3.bf16.msra.mxu1 %v1375_v56 }
 0x406   :  { %1377 = vmatprep.subr.bf16.mxu1 %v1608_v0 }
 0x407   :  { %v597_v60 = vld [vmem:[#allocation2] sm:$0xff] }
 0x408   :  { %v677_v63 = vrot.slane %v597_v60, %v676_v59  ;;  %v670_v2 = vcombine.high %v597_v60, %v597_v60  ;;  %v840_v60 = vld [vmem:[#allocation14 + $0x40] sm:$0xff] }
 0x409   :  { %v1381_v62 = vpack.c.bf16 %v841_v61, %v840_v60 }
 0x40a   :  { %v685_v1 = vcombine.high %v677_v63, %v677_v63  ;;  %v684_v6 = vrot.slane %v670_v2, %v676_v59  ;;  %v1378_v59 = vpack.c.bf16 %v839_v58, %v838_v57  ;;  %v843_v2 = vld [vmem:[#allocation14 + $0x58] sm:$0xff] }
 0x40c   :  { %755 = vmatprep.mubr.f32.mxu0 %v685_v1  ;;  %v686_v10 = vcombine.high %v684_v6, %v684_v6  ;;  %1379 = vmatpush3.bf16.msra.mxu1 %v1378_v59  ;;  %v845_v1 = vld [vmem:[#allocation14 + $0x68] sm:$0xff] }
 0x40d   :  { %756 = vmatmul.mubr.f32.vlgmr.msra.gmra.mrb[4].mxu0 %v677_v63  ;;  %1380 = vmatprep.subr.bf16.mxu1 %v1608_v0  ;;  %v842_v63 = vld [vmem:[#allocation14 + $0x50] sm:$0xff] }
 0x40e   :  { %1339 = vmatpush3.bf16.msra.mxu0 %v1338_v5  ;;  %825 = vmatprep.mubr.f32.mxu0 %v686_v10  ;;  %v1384_v3 = vpack.c.bf16 %v843_v2, %v842_v63  ;;  %v1387_v5 = vpack.c.bf16 %v845_v1, %v844_v4 }
 0x40f   :  { %1341 = vmatprep.subr.bf16.mxu0 %v1340_v7  ;;  %v847_v7 = vld [vmem:[#allocation14 + $0x78] sm:$0xff] }
 0x410   :  { %1382 = vmatpush3.bf16.msra.mxu1 %v1381_v62 }
 0x411   :  { %1383 = vmatprep.subr.bf16.mxu1 %v1608_v0 }
 0x412   :  { %1343 = vmatpush3.bf16.msra.mxu0 %v1342_v13 }
 0x413   :  { %1345 = vmatprep.subr.bf16.mxu0 %v1344_v14 }
 0x414   :  { %1385 = vmatpush3.bf16.msra.mxu1 %v1384_v3 }
 0x415   :  { %1386 = vmatprep.subr.bf16.mxu1 %v1608_v0 }
 0x416   :  { %1347 = vmatpush3.bf16.msra.mxu0 %v1346_v19 }
 0x417   :  { %1349 = vmatprep.subr.bf16.mxu0 %v1348_v20 }
 0x418   :  { %1388 = vmatpush3.bf16.msra.mxu1 %v1387_v5 }
 0x419   :  { %1389 = vmatprep.subr.bf16.mxu1 %v1608_v0  ;;  %v952_v0 = vld [vmem:[%s1857_s12] ss:$0 sm:$0xff] }
 0x41a   :  { %1351 = vmatpush3.bf16.msra.mxu0 %v1350_v25 }
 0x41b   :  { %1353 = vmatprep.subr.bf16.mxu0 %v1352_v26 }
 0x41e   :  { %1355 = vmatpush3.bf16.msra.mxu0 %v1354_v31 }
 0x41f   :  { %1357 = vmatprep.subr.bf16.mxu0 %v1356_v32 }
 0x422   :  { %1359 = vmatpush3.bf16.msra.mxu0 %v1358_v37 }
 0x423   :  { %1361 = vmatprep.subr.bf16.mxu0 %v1360_v38 }
 0x426   :  { %1363 = vmatpush3.bf16.msra.mxu0 %v1362_v43 }
 0x427   :  { %1365 = vmatprep.subr.bf16.mxu0 %v1364_v44 }
 0x42a   :  { %1367 = vmatpush3.bf16.msra.mxu0 %v1366_v47 }
 0x42d   :  { %826 = vmatmul.mubr.f32.vlgmr.msra.gmra.mrb[6].mxu0 %v684_v6  ;;  %v846_v6 = vld [vmem:[#allocation14 + $0x70] sm:$0xff] }
 0x42e   :  { %v1390_v8 = vpack.c.bf16 %v847_v7, %v846_v6 }
 0x430   :  { %1391 = vmatpush3.bf16.msra.mxu1 %v1390_v8 }
 0x4e0   :  { %v1022_v9 = vpop.f32.mrb[4].mxu0 }
 0x4e1   :  { %v1023_v10 = vpop.f32.mrb[5].mxu0 }
 0x4e2   :  { %v1024_v11 = vadd.f32 %v1023_v10, %v1022_v9 }
 0x4e4   :  { %v758_v15 = vadd.f32 %v1024_v11, %v951_v12 }
 0x500   :  { %v1057_v13 = vpop.f32.mrb[6].mxu0 }
 0x501   :  { %v1058_v14 = vpop.f32.mrb[7].mxu0 }
 0x502   :  { %v1059_v16 = vadd.f32 %v1058_v14, %v1057_v13 }
 0x504   :  { %v828_v17 = vadd.f32 %v1059_v16, %v758_v15 }
 0x506   :  { %v831_v18 = vmax.f32 %v828_v17, 0.0 }
 0x508   :  { %1187 = vmatmul.mubr.f32.vlgmr.msra.gmra.mrb[4].mxu1 %v831_v18 }
 0x5db   :  { %v921_v19 = vpop.f32.mrb[4].mxu1 }
 0x5dc   :  { %v922_v20 = vadd.f32 %v952_v0, %v921_v19  ;;  %v1188_v21 = vpop.f32.mrb[5].mxu1 }
 0x5de   :  { %1409 = vtanh.f32 %v922_v20 }
 0x5e8   :  { %v1410_v22 = vpop.eup %1409 }
 0x5e9   :  { %926 = vst [vmem:[#allocation15] sm:$0x3] %v1410_v22 }
 0x5ea   :  { %1576 = shalt.err (!%p1573_p4)
}
 0x5eb   :  { %s1577_s12 = scalar_lea.hbm %s1858_s13, 32 }
 0x5ec   :  { %p1578_p5 = scmp.ne.s32.totalorder %s1858_s13, %s1577_s12  ;;  %p1581_p6 = scmp.lt.u32.totalorder %s1577_s12, %s1858_s13 }
 0x5ee   :  { %p1583_p7 = pnand %p1581_p6, %p1578_p5 }
 0x5f0   :  { %1586 = shalt.err (!%p1583_p7)
}
 0x5f1   :  { %936 = dma.vmem_to_hbm [thread:$0]  %s934_s1, 32, %s1858_s13, [#allocation5]  }
 0x5f2   :  { %1595 = dma.done.wait [#allocation5], 32  }
 0x5f3   :  { %1596 = vsyncadd [#allocation5], 4294967264 }
 0x5f4   :  { %940 = vsyncpa [#allocation4], 1 }
 0x5f5   :  { %941 = vsyncpa [#allocation7], 1 }
 0x5f6   :  { %942 = vsyncpa [#allocation10], 1 }
 0x5f7   :  { %943 = vsyncpa [#allocation13], 1 }
 0x5f8   :  { %944 = vsyncpa [#allocation5], 1 }

// kernel: tpu_custom_call.1
= control target key start
LH: loop header
LB: loop body
LE: loop exit
PB: predicated region body
PF: predicated region fallthrough
CT: control target
= control target key end

     0   :  { %18 = vsyncpa [#allocation4], 0  ;;  %s1845_s0 = inlined_call_operand.hbm [shape: f32[2,16], index: 0, kind: input, shape index: {}]   ;;  %s1846_s1 = inlined_call_operand.hbm [shape: f32[16,128], index: 1, kind: input, shape index: {}]   ;;  %s1847_s2 = inlined_call_operand.vmem [shape: f32[1,128], index: 2, kind: input, shape index: {}]   ;;  %s1848_s3 = inlined_call_operand.hbm [shape: f32[128,128], index: 3, kind: input, shape index: {}]   ;;  %s1849_s4 = inlined_call_operand.vmem [shape: f32[1,128], index: 4, kind: input, shape index: {}]   ;;  %s1850_s5 = inlined_call_operand.hbm [shape: f32[128,128], index: 5, kind: input, shape index: {}]   ;;  %s1851_s6 = inlined_call_operand.vmem [shape: f32[1,128], index: 6, kind: input, shape index: {}]   ;;  %s1852_s7 = inlined_call_operand.hbm [shape: f32[256,256], index: 7, kind: input, shape index: {}]   ;;  %s1853_s8 = inlined_call_operand.vmem [shape: f32[1,256], index: 8, kind: input, shape index: {}]   ;;  %s1854_s9 = inlined_call_operand.hbm [shape: f32[512,128], index: 9, kind: input, shape index: {}]   ;;  %s1855_s10 = inlined_call_operand.vmem [shape: f32[1,128], index: 10, kind: input, shape index: {}]   ;;  %s1856_s11 = inlined_call_operand.hbm [shape: f32[128,128], index: 11, kind: input, shape index: {}]   ;;  %s1857_s12 = inlined_call_operand.vmem [shape: f32[1,128], index: 12, kind: input, shape index: {}]   ;;  %s1858_s13 = inlined_call_operand.hbm [shape: f32[2,128], index: 13, kind: output, shape index: {}]  }
   0x1   :  { %19 = vsyncpa [#allocation7], 0 }
   0x2   :  { %20 = vsyncpa [#allocation10], 0 }
   0x3   :  { %21 = vsyncpa [#allocation13], 0 }
   0x4   :  { %22 = vsyncpa [#allocation5], 0  ;;  %s1597_s25 = smov [#allocation6]   ;;  %s1411_s29 = scalar_lea.hbm %s1846_s1, 256 }
   0x5   :  { %s38_s26 = sshll.u32 %s1597_s25, 4  ;;  %p1412_p0 = scmp.ne.s32.totalorder %s1846_s1, %s1411_s29  ;;  %s39_s26 = int_to_ptr.vmem [resolvable:$true] %s38_s26 }
   0x6   :  { %p1415_p1 = scmp.lt.u32.totalorder %s1411_s29, %s1846_s1 }
   0x8   :  { %p1417_p2 = pnand %p1415_p1, %p1412_p0 }
   0xa   :  { %1420 = shalt.err (!%p1417_p2)
}
   0xb   :  { %s1421_s17 = scalar_lea.vmem %s39_s26, 256  ;;  %p1426_p4 = scmp.lt.s32.totalorder %s39_s26, %s39_s26 }
   0xc   :  { %p1422_p3 = scmp.ne.s32.totalorder %s39_s26, %s1421_s17  ;;  %p1427_p5 = scmp.lt.s32.totalorder %s1421_s17, %s1421_s17 }
   0xe   :  { %p1428_p6 = por %p1427_p5, %p1426_p4 }
  0x10   :  { %p1429_p7 = pnand %p1428_p6, %p1422_p3 }
  0x12   :  { %1432 = shalt.err (!%p1429_p7)
}
  0x13   :  { %s1598_s18 = smov 128   ;;  %s1599_s19 = smov 8  }
  0x14   :  { %44 = dma.hbm_to_vmem [thread:$0]  %s1846_s1, 256, %s39_s26, [#allocation7], %s1598_s18, %s1598_s18, %s1599_s19  }
  0x15   :  { %s1600_s22 = smov [#allocation9]   ;;  %s1601_s24 = smov [#allocation12]  }
  0x16   :  { %s66_s23 = sshll.u32 %s1600_s22, 4  ;;  %s94_s25 = sshll.u32 %s1601_s24, 4  ;;  %s67_s23 = int_to_ptr.vmem [resolvable:$true] %s66_s23  ;;  %s95_s25 = int_to_ptr.vmem [resolvable:$true] %s94_s25 }
  0x17   :  { %s1433_s29 = scalar_lea.hbm %s1850_s5, 2048 }
  0x18   :  { %p1434_p8 = scmp.ne.s32.totalorder %s1850_s5, %s1433_s29  ;;  %p1437_p9 = scmp.lt.u32.totalorder %s1433_s29, %s1850_s5 }
  0x1a   :  { %p1439_p10 = pnand %p1437_p9, %p1434_p8 }
  0x1c   :  { %1442 = shalt.err (!%p1439_p10)
}
  0x1d   :  { %s1443_s1 = scalar_lea.vmem %s67_s23, 2048  ;;  %p1448_p12 = scmp.lt.s32.totalorder %s67_s23, %s67_s23 }
  0x1e   :  { %p1444_p11 = scmp.ne.s32.totalorder %s67_s23, %s1443_s1  ;;  %p1449_p13 = scmp.lt.s32.totalorder %s1443_s1, %s1443_s1 }
  0x20   :  { %p1450_p0 = por %p1449_p13, %p1448_p12 }
  0x22   :  { %p1451_p1 = pnand %p1450_p0, %p1444_p11 }
  0x24   :  { %1454 = shalt.err (!%p1451_p1)
}
  0x25   :  { %72 = dma.hbm_to_vmem [thread:$0]  %s1850_s5, 2048, %s67_s23, [#allocation10], %s1598_s18, %s1598_s18, %s1599_s19  }
  0x26   :  { %s1455_s22 = scalar_lea.hbm %s1854_s9, 8192 }
  0x27   :  { %p1456_p2 = scmp.ne.s32.totalorder %s1854_s9, %s1455_s22  ;;  %p1459_p3 = scmp.lt.u32.totalorder %s1455_s22, %s1854_s9 }
  0x29   :  { %p1461_p4 = pnand %p1459_p3, %p1456_p2 }
  0x2b   :  { %1464 = shalt.err (!%p1461_p4)
}
  0x2c   :  { %s1465_s30 = scalar_lea.vmem %s95_s25, 8192  ;;  %p1470_p6 = scmp.lt.s32.totalorder %s95_s25, %s95_s25 }
  0x2d   :  { %p1466_p5 = scmp.ne.s32.totalorder %s95_s25, %s1465_s30  ;;  %p1471_p7 = scmp.lt.s32.totalorder %s1465_s30, %s1465_s30 }
  0x2f   :  { %p1472_p8 = por %p1471_p7, %p1470_p6 }
  0x31   :  { %p1473_p9 = pnand %p1472_p8, %p1466_p5 }
  0x33   :  { %1476 = shalt.err (!%p1473_p9)
}
  0x34   :  { %100 = dma.hbm_to_vmem [thread:$0]  %s1854_s9, 8192, %s95_s25, [#allocation13], %s1598_s18, %s1598_s18, %s1599_s19  }
  0x35   :  { %s1602_s14 = smov [#allocation3]   ;;  %s1603_s16 = smov [#allocation8]  }
  0x36   :  { %s29_s15 = sshll.u32 %s1602_s14, 4  ;;  %s52_s1 = sshll.u32 %s1603_s16, 4  ;;  %s30_s15 = int_to_ptr.vmem [resolvable:$true] %s29_s15  ;;  %s53_s1 = int_to_ptr.vmem [resolvable:$true] %s52_s1 }
  0x37   :  { %s1477_s20 = scalar_lea.hbm %s1845_s0, 32 }
  0x38   :  { %p1478_p10 = scmp.ne.s32.totalorder %s1845_s0, %s1477_s20  ;;  %p1481_p11 = scmp.lt.u32.totalorder %s1477_s20, %s1845_s0 }
  0x3a   :  { %p1483_p12 = pnand %p1481_p11, %p1478_p10 }
  0x3c   :  { %1486 = shalt.err (!%p1483_p12)
}
  0x3d   :  { %s1487_s9 = scalar_lea.vmem %s30_s15, 32  ;;  %p1492_p0 = scmp.lt.s32.totalorder %s30_s15, %s30_s15 }
  0x3e   :  { %p1488_p13 = scmp.ne.s32.totalorder %s30_s15, %s1487_s9  ;;  %p1493_p1 = scmp.lt.s32.totalorder %s1487_s9, %s1487_s9 }
  0x40   :  { %p1494_p2 = por %p1493_p1, %p1492_p0 }
  0x42   :  { %p1495_p3 = pnand %p1494_p2, %p1488_p13 }
  0x44   :  { %1498 = shalt.err (!%p1495_p3)
}
  0x45   :  { %32 = dma.hbm_to_vmem [thread:$0]  %s1845_s0, 32, %s30_s15, [#allocation4]  }
  0x46   :  { %s1499_s5 = scalar_lea.hbm %s1848_s3, 2048 }
  0x47   :  { %p1500_p4 = scmp.ne.s32.totalorder %s1848_s3, %s1499_s5  ;;  %p1503_p5 = scmp.lt.u32.totalorder %s1499_s5, %s1848_s3 }
  0x49   :  { %p1505_p6 = pnand %p1503_p5, %p1500_p4 }
  0x4b   :  { %1508 = shalt.err (!%p1505_p6)
}
  0x4c   :  { %s1509_s17 = scalar_lea.vmem %s53_s1, 2048  ;;  %p1514_p8 = scmp.lt.s32.totalorder %s53_s1, %s53_s1 }
  0x4d   :  { %p1510_p7 = scmp.ne.s32.totalorder %s53_s1, %s1509_s17  ;;  %p1515_p9 = scmp.lt.s32.totalorder %s1509_s17, %s1509_s17 }
  0x4f   :  { %p1516_p10 = por %p1515_p9, %p1514_p8 }
  0x51   :  { %p1517_p11 = pnand %p1516_p10, %p1510_p7 }
  0x53   :  { %1520 = shalt.err (!%p1517_p11)
}
  0x54   :  { %58 = dma.hbm_to_vmem [thread:$0]  %s1848_s3, 2048, %s53_s1, [#allocation7], %s1598_s18, %s1598_s18, %s1599_s19  }
  0x55   :  { %s1604_s20 = smov [#allocation11]   ;;  %s1521_s27 = scalar_lea.hbm %s1852_s7, 8192 }
  0x56   :  { %s80_s21 = sshll.u32 %s1604_s20, 4  ;;  %p1522_p12 = scmp.ne.s32.totalorder %s1852_s7, %s1521_s27  ;;  %s81_s21 = int_to_ptr.vmem [resolvable:$true] %s80_s21 }
  0x57   :  { %p1525_p13 = scmp.lt.u32.totalorder %s1521_s27, %s1852_s7 }
  0x59   :  { %p1527_p0 = pnand %p1525_p13, %p1522_p12 }
  0x5b   :  { %1530 = shalt.err (!%p1527_p0)
}
  0x5c   :  { %s1531_s30 = scalar_lea.vmem %s81_s21, 8192  ;;  %p1536_p2 = scmp.lt.s32.totalorder %s81_s21, %s81_s21 }
  0x5d   :  { %p1532_p1 = scmp.ne.s32.totalorder %s81_s21, %s1531_s30  ;;  %p1537_p3 = scmp.lt.s32.totalorder %s1531_s30, %s1531_s30 }
  0x5f   :  { %p1538_p4 = por %p1537_p3, %p1536_p2 }
  0x61   :  { %p1539_p5 = pnand %p1538_p4, %p1532_p1 }
  0x63   :  { %1542 = shalt.err (!%p1539_p5)
}
  0x64   :  { %s1605_s3 = smov 256   ;;  %s1606_s1 = smov 16  }
  0x65   :  { %86 = dma.hbm_to_vmem [thread:$0]  %s1852_s7, 8192, %s81_s21, [#allocation10], %s1605_s3, %s1605_s3, %s1606_s1  }
  0x66   :  { %s1607_s14 = smov [#allocation14]   ;;  %s1543_s0 = scalar_lea.hbm %s1856_s11, 2048 }
  0x67   :  { %s108_s16 = sshll.u32 %s1607_s14, 4  ;;  %p1544_p6 = scmp.ne.s32.totalorder %s1856_s11, %s1543_s0  ;;  %s109_s16 = int_to_ptr.vmem [resolvable:$true] %s108_s16 }
  0x68   :  { %p1547_p7 = scmp.lt.u32.totalorder %s1543_s0, %s1856_s11 }
  0x6a   :  { %p1549_p8 = pnand %p1547_p7, %p1544_p6 }
  0x6c   :  { %1552 = shalt.err (!%p1549_p8)
}
  0x6d   :  { %s1553_s27 = scalar_lea.vmem %s109_s16, 2048  ;;  %p1558_p10 = scmp.lt.s32.totalorder %s109_s16, %s109_s16 }
  0x6e   :  { %p1554_p9 = scmp.ne.s32.totalorder %s109_s16, %s1553_s27  ;;  %p1559_p11 = scmp.lt.s32.totalorder %s1553_s27, %s1553_s27 }
  0x70   :  { %p1560_p12 = por %p1559_p11, %p1558_p10 }
  0x72   :  { %p1561_p13 = pnand %p1560_p12, %p1554_p9 }
  0x74   :  { %1564 = shalt.err (!%p1561_p13)
}
  0x75   :  { %114 = dma.hbm_to_vmem [thread:$0]  %s1856_s11, 2048, %s109_s16, [#allocation13], %s1598_s18, %s1598_s18, %s1599_s19  }
  0x76   :  { %1587 = dma.done.wait [#allocation4], 32  }
  0x77   :  { %1588 = vsyncadd [#allocation4], 4294967264 }
  0x78   :  { %1589 = dma.done.wait [#allocation7], 2304  }
  0x79   :  { %1590 = vsyncadd [#allocation7], 4294964992 }
  0x7a   :  { %1591 = dma.done.wait [#allocation10], 10240  }
  0x7b   :  { %1592 = vsyncadd [#allocation10], 4294957056 }
  0x7c   :  { %1593 = dma.done.wait [#allocation13], 10240  }
  0x7d   :  { %1594 = vsyncadd [#allocation13], 4294957056  ;;  %v1608_v0 = vmov 0.0|0.0   ;;  %vm1609_vm0 = vmmov 0   ;;  %v1610_v1 = vmov 0.0   ;;  %v139_v2 = vld [vmem:[#allocation6] sm:$0xff] }
  0x7e   :  { %1189 = vmatprep.subr.bf16.mxu0 %v1608_v0  ;;  %1081 = vmatprep.mubr.msk.f32.mxu0 %vm1609_vm0, %v1610_v1  ;;  %v140_v3 = vld [vmem:[#allocation6 + $0x8] sm:$0xff]  ;;  %v223_v5 = vld [vmem:[#allocation8] sm:$0xff]  ;;  %v224_v6 = vld [vmem:[#allocation8 + $0x8] sm:$0xff]  ;;  %vm148_vm1 = vcmask 130048   ;;  %s1612_s3 = smov [#allocation15]  }
  0x7f   :  { %1192 = vmatprep.subr.bf16.mxu1 %v1608_v0  ;;  %1116 = vmatprep.mubr.msk.f32.mxu1 %vm1609_vm0, %v1610_v1  ;;  %v1190_v4 = vpack.c.bf16 %v140_v3, %v139_v2  ;;  %v225_v7 = vld [vmem:[#allocation8 + $0x10] sm:$0xff]  ;;  %v1193_v8 = vpack.c.bf16 %v224_v6, %v223_v5  ;;  %v226_v9 = vld [vmem:[#allocation8 + $0x18] sm:$0xff]  ;;  %v138_v10 = vld [vmem:[#allocation3] sm:$0x3]  ;;  %s933_s1 = sshll.u32 %s1612_s3, 4  ;;  %s934_s1 = int_to_ptr.vmem [resolvable:$true] %s933_s1 }
  0x80   :  { %v1196_v11 = vpack.c.bf16 %v226_v9, %v225_v7  ;;  %v227_v12 = vld [vmem:[#allocation8 + $0x20] sm:$0xff]  ;;  %v228_v13 = vld [vmem:[#allocation8 + $0x28] sm:$0xff]  ;;  %v229_v15 = vld [vmem:[#allocation8 + $0x30] sm:$0xff]  ;;  %p1570_p1 = scmp.lt.s32.totalorder %s934_s1, %s934_s1 }
  0x81   :  { %1191 = vmatpush3.bf16.msra.mxu0 %v1190_v4  ;;  %1194 = vmatpush3.bf16.msra.mxu1 %v1193_v8  ;;  %v1199_v14 = vpack.c.bf16 %v228_v13, %v227_v12  ;;  %v230_v16 = vld [vmem:[#allocation8 + $0x38] sm:$0xff]  ;;  %v231_v18 = vld [vmem:[#allocation8 + $0x40] sm:$0xff]  ;;  %v232_v19 = vld [vmem:[#allocation8 + $0x48] sm:$0xff] }
  0x82   :  { %1216 = vmatprep.subr.bf16.mxu0 %v1608_v0  ;;  %1195 = vmatprep.subr.bf16.mxu1 %v1608_v0  ;;  %v1202_v17 = vpack.c.bf16 %v230_v16, %v229_v15  ;;  %v1205_v20 = vpack.c.bf16 %v232_v19, %v231_v18  ;;  %v233_v21 = vld [vmem:[#allocation8 + $0x50] sm:$0xff]  ;;  %v234_v22 = vld [vmem:[#allocation8 + $0x58] sm:$0xff]  ;;  %v235_v24 = vld [vmem:[#allocation8 + $0x60] sm:$0xff] }
  0x83   :  { %v1208_v23 = vpack.c.bf16 %v234_v22, %v233_v21  ;;  %v236_v25 = vld [vmem:[#allocation8 + $0x68] sm:$0xff]  ;;  %v237_v27 = vld [vmem:[#allocation8 + $0x70] sm:$0xff]  ;;  %v238_v28 = vld [vmem:[#allocation8 + $0x78] sm:$0xff] }
  0x84   :  { %1082 = vmatmul.mubr.msk.f32.vlgmr.msra.gmra.mrb[0].mxu0 %vm148_vm1, %v138_v10  ;;  %v1211_v26 = vpack.c.bf16 %v236_v25, %v235_v24  ;;  %v1214_v29 = vpack.c.bf16 %v238_v28, %v237_v27  ;;  %v317_v30 = vld [vmem:[#allocation9] sm:$0xff]  ;;  %v318_v31 = vld [vmem:[#allocation9 + $0x8] sm:$0xff]  ;;  %v319_v32 = vld [vmem:[#allocation9 + $0x10] sm:$0xff] }
  0x85   :  { %1151 = vmatprep.mubr.msk.f32.mxu0 %vm1609_vm0, %v1610_v1  ;;  %1197 = vmatpush3.bf16.msra.mxu1 %v1196_v11  ;;  %v1217_v33 = vpack.c.bf16 %v318_v31, %v317_v30  ;;  %v320_v34 = vld [vmem:[#allocation9 + $0x18] sm:$0xff]  ;;  %v321_v36 = vld [vmem:[#allocation9 + $0x20] sm:$0xff]  ;;  %v322_v37 = vld [vmem:[#allocation9 + $0x28] sm:$0xff] }
  0x86   :  { %1198 = vmatprep.subr.bf16.mxu1 %v1608_v0  ;;  %v1220_v35 = vpack.c.bf16 %v320_v34, %v319_v32  ;;  %v1223_v38 = vpack.c.bf16 %v322_v37, %v321_v36  ;;  %v323_v39 = vld [vmem:[#allocation9 + $0x30] sm:$0xff]  ;;  %v324_v40 = vld [vmem:[#allocation9 + $0x38] sm:$0xff]  ;;  %v325_v42 = vld [vmem:[#allocation9 + $0x40] sm:$0xff] }
  0x87   :  { %1218 = vmatpush3.bf16.msra.mxu0 %v1217_v33  ;;  %v1226_v41 = vpack.c.bf16 %v324_v40, %v323_v39  ;;  %v326_v43 = vld [vmem:[#allocation9 + $0x48] sm:$0xff]  ;;  %v327_v45 = vld [vmem:[#allocation9 + $0x50] sm:$0xff]  ;;  %v328_v46 = vld [vmem:[#allocation9 + $0x58] sm:$0xff] }
  0x88   :  { %1219 = vmatprep.subr.bf16.mxu0 %v1608_v0  ;;  %v1229_v44 = vpack.c.bf16 %v326_v43, %v325_v42  ;;  %v1232_v47 = vpack.c.bf16 %v328_v46, %v327_v45  ;;  %v329_v48 = vld [vmem:[#allocation9 + $0x60] sm:$0xff]  ;;  %v330_v49 = vld [vmem:[#allocation9 + $0x68] sm:$0xff]  ;;  %v331_v56 = vld [vmem:[#allocation9 + $0x70] sm:$0xff] }
  0x89   :  { %1200 = vmatpush3.bf16.msra.mxu1 %v1199_v14  ;;  %v1235_v50 = vpack.c.bf16 %v330_v49, %v329_v48  ;;  %v945_v51 = vld [vmem:[%s1847_s2] ss:$0 sm:$0xff]  ;;  %v332_v57 = vld [vmem:[#allocation9 + $0x78] sm:$0xff]  ;;  %v418_v59 = vld [vmem:[#allocation11 + $0x8] sm:$0xff] }
  0x8a   :  { %1201 = vmatprep.subr.bf16.mxu1 %v1608_v0  ;;  %v1238_v58 = vpack.c.bf16 %v332_v57, %v331_v56  ;;  %v420_v60 = vld [vmem:[#allocation11 + $0x18] sm:$0xff]  ;;  %v417_v61 = vld [vmem:[#allocation11] sm:$0xff]  ;;  %v419_v63 = vld [vmem:[#allocation11 + $0x10] sm:$0xff] }
  0x8b   :  { %1221 = vmatpush3.bf16.msra.mxu0 %v1220_v35  ;;  %v1240_v62 = vpack.c.bf16 %v420_v60, %v418_v59  ;;  %v422_v2 = vld [vmem:[#allocation11 + $0x28] sm:$0xff]  ;;  %v424_v3 = vld [vmem:[#allocation11 + $0x38] sm:$0xff]  ;;  %v1242_v4 = vpack.c.bf16 %v419_v63, %v417_v61  ;;  %v421_v6 = vld [vmem:[#allocation11 + $0x20] sm:$0xff] }
  0x8c   :  { %1222 = vmatprep.subr.bf16.mxu0 %v1608_v0  ;;  %v1244_v5 = vpack.c.bf16 %v424_v3, %v422_v2  ;;  %v423_v7 = vld [vmem:[#allocation11 + $0x30] sm:$0xff]  ;;  %v426_v8 = vld [vmem:[#allocation11 + $0x48] sm:$0xff]  ;;  %v428_v9 = vld [vmem:[#allocation11 + $0x58] sm:$0xff] }
  0x8d   :  { %1203 = vmatpush3.bf16.msra.mxu1 %v1202_v17  ;;  %v1246_v10 = vpack.c.bf16 %v423_v7, %v421_v6  ;;  %v1248_v11 = vpack.c.bf16 %v428_v9, %v426_v8  ;;  %v425_v12 = vld [vmem:[#allocation11 + $0x40] sm:$0xff]  ;;  %v427_v13 = vld [vmem:[#allocation11 + $0x50] sm:$0xff]  ;;  %v430_v14 = vld [vmem:[#allocation11 + $0x68] sm:$0xff] }
  0x8e   :  { %1204 = vmatprep.subr.bf16.mxu1 %v1608_v0  ;;  %v432_v15 = vld [vmem:[#allocation11 + $0x78] sm:$0xff]  ;;  %v1250_v16 = vpack.c.bf16 %v427_v13, %v425_v12  ;;  %v429_v18 = vld [vmem:[#allocation11 + $0x60] sm:$0xff]  ;;  %v431_v19 = vld [vmem:[#allocation11 + $0x70] sm:$0xff] }
  0x8f   :  { %1224 = vmatpush3.bf16.msra.mxu0 %v1223_v38  ;;  %v1252_v17 = vpack.c.bf16 %v432_v15, %v430_v14  ;;  %v436_v21 = vld [vmem:[#allocation11 + $0x98] sm:$0xff]  ;;  %v1254_v22 = vpack.c.bf16 %v431_v19, %v429_v18  ;;  %v433_v24 = vld [vmem:[#allocation11 + $0x80] sm:$0xff]  ;;  %v435_v25 = vld [vmem:[#allocation11 + $0x90] sm:$0xff] }
  0x90   :  { %1225 = vmatprep.subr.bf16.mxu0 %v1608_v0  ;;  %v440_v27 = vld [vmem:[#allocation11 + $0xb8] sm:$0xff]  ;;  %v1258_v28 = vpack.c.bf16 %v435_v25, %v433_v24  ;;  %v437_v30 = vld [vmem:[#allocation11 + $0xa0] sm:$0xff]  ;;  %v439_v31 = vld [vmem:[#allocation11 + $0xb0] sm:$0xff] }
  0x91   :  { %1206 = vmatpush3.bf16.msra.mxu1 %v1205_v20  ;;  %v434_v20 = vld [vmem:[#allocation11 + $0x88] sm:$0xff]  ;;  %v444_v33 = vld [vmem:[#allocation11 + $0xd8] sm:$0xff]  ;;  %v1262_v34 = vpack.c.bf16 %v439_v31, %v437_v30  ;;  %v441_v36 = vld [vmem:[#allocation11 + $0xc0] sm:$0xff] }
  0x92   :  { %1207 = vmatprep.subr.bf16.mxu1 %v1608_v0  ;;  %v442_v32 = vld [vmem:[#allocation11 + $0xc8] sm:$0xff]  ;;  %v443_v37 = vld [vmem:[#allocation11 + $0xd0] sm:$0xff]  ;;  %v448_v39 = vld [vmem:[#allocation11 + $0xf8] sm:$0xff] }
  0x93   :  { %1227 = vmatpush3.bf16.msra.mxu0 %v1226_v41  ;;  %v1264_v35 = vpack.c.bf16 %v444_v33, %v442_v32  ;;  %v446_v38 = vld [vmem:[#allocation11 + $0xe8] sm:$0xff]  ;;  %v1266_v40 = vpack.c.bf16 %v443_v37, %v441_v36  ;;  %v445_v42 = vld [vmem:[#allocation11 + $0xe0] sm:$0xff]  ;;  %v447_v43 = vld [vmem:[#allocation11 + $0xf0] sm:$0xff] }
  0x94   :  { %1228 = vmatprep.subr.bf16.mxu0 %v1608_v0  ;;  %v1268_v41 = vpack.c.bf16 %v448_v39, %v446_v38  ;;  %v452_v45 = vld [vmem:[#allocation11 + $0x118] sm:$0xff]  ;;  %v1270_v46 = vpack.c.bf16 %v447_v43, %v445_v42  ;;  %v449_v48 = vld [vmem:[#allocation11 + $0x100] sm:$0xff]  ;;  %v451_v49 = vld [vmem:[#allocation11 + $0x110] sm:$0xff] }
  0x95   :  { %1209 = vmatpush3.bf16.msra.mxu1 %v1208_v23  ;;  %v1256_v23 = vpack.c.bf16 %v436_v21, %v434_v20  ;;  %v947_v57 = vld [vmem:[%s1849_s4] ss:$0 sm:$0xff]  ;;  %v458_v61 = vld [vmem:[#allocation11 + $0x148] sm:$0xff]  ;;  %v459_v3 = vld [vmem:[#allocation11 + $0x150] sm:$0xff] }
  0x96   :  { %1210 = vmatprep.subr.bf16.mxu1 %v1608_v0  ;;  %v457_v2 = vld [vmem:[#allocation11 + $0x140] sm:$0xff]  ;;  %v464_v6 = vld [vmem:[#allocation11 + $0x178] sm:$0xff]  ;;  %v463_v9 = vld [vmem:[#allocation11 + $0x170] sm:$0xff] }
  0x97   :  { %1230 = vmatpush3.bf16.msra.mxu0 %v1229_v44  ;;  %v450_v44 = vld [vmem:[#allocation11 + $0x108] sm:$0xff]  ;;  %v461_v8 = vld [vmem:[#allocation11 + $0x160] sm:$0xff]  ;;  %v468_v12 = vld [vmem:[#allocation11 + $0x198] sm:$0xff] }
  0x98   :  { %1231 = vmatprep.subr.bf16.mxu0 %v1608_v0  ;;  %v465_v14 = vld [vmem:[#allocation11 + $0x180] sm:$0xff]  ;;  %v467_v15 = vld [vmem:[#allocation11 + $0x190] sm:$0xff]  ;;  %v472_v18 = vld [vmem:[#allocation11 + $0x1b8] sm:$0xff] }
  0x99   :  { %1212 = vmatpush3.bf16.msra.mxu1 %v1211_v26  ;;  %v438_v26 = vld [vmem:[#allocation11 + $0xa8] sm:$0xff]  ;;  %v469_v20 = vld [vmem:[#allocation11 + $0x1a0] sm:$0xff]  ;;  %v471_v21 = vld [vmem:[#allocation11 + $0x1b0] sm:$0xff] }
  0x9a   :  { %1213 = vmatprep.subr.bf16.mxu1 %v1608_v0  ;;  %v476_v24 = vld [vmem:[#allocation11 + $0x1d8] sm:$0xff]  ;;  %v473_v25 = vld [vmem:[#allocation11 + $0x1c0] sm:$0xff]  ;;  %v479_v33 = vld [vmem:[#allocation11 + $0x1f0] sm:$0xff] }
  0x9b   :  { %1233 = vmatpush3.bf16.msra.mxu0 %v1232_v47  ;;  %v1272_v47 = vpack.c.bf16 %v452_v45, %v450_v44  ;;  %v477_v32 = vld [vmem:[#allocation11 + $0x1e0] sm:$0xff]  ;;  %v615_v36 = vld [vmem:[#allocation12 + $0x88] sm:$0xff] }
  0x9c   :  { %1234 = vmatprep.subr.bf16.mxu0 %v1608_v0  ;;  %v598_v37 = vld [vmem:[#allocation12] sm:$0xff]  ;;  %v599_v39 = vld [vmem:[#allocation12 + $0x8] sm:$0xff] }
  0x9d   :  { %1215 = vmatpush3.bf16.msra.mxu1 %v1214_v29  ;;  %v1260_v29 = vpack.c.bf16 %v440_v27, %v438_v26  ;;  %v475_v27 = vld [vmem:[#allocation11 + $0x1d0] sm:$0xff] }
  0x9e   :  { %1241 = vmatprep.subr.bf16.mxu1 %v1240_v62  ;;  %v460_v62 = vld [vmem:[#allocation11 + $0x158] sm:$0xff]  ;;  %v1298_v30 = vpack.c.bf16 %v475_v27, %v473_v25 }
  0x9f   :  { %1236 = vmatpush3.bf16.msra.mxu0 %v1235_v50  ;;  %v454_v50 = vld [vmem:[#allocation11 + $0x128] sm:$0xff]  ;;  %v1280_v63 = vpack.c.bf16 %v460_v62, %v458_v61  ;;  %v602_v61 = vld [vmem:[#allocation12 + $0x20] sm:$0xff]  ;;  %v629_v25 = vld [vmem:[#allocation12 + $0xf8] sm:$0xff] }
  0xa0   :  { %1237 = vmatprep.subr.bf16.mxu0 %v1608_v0  ;;  %v603_v62 = vld [vmem:[#allocation12 + $0x28] sm:$0xff] }
  0xa3   :  { %1239 = vmatpush3.bf16.msra.mxu0 %v1238_v58 }
 0x157   :  { %v218_v52 = vpop.f32.mrb[0].mxu0 }
 0x158   :  { %v219_v53 = vadd.f32 %v945_v51, %v218_v52  ;;  %v1083_v54 = vpop.f32.mrb[1].mxu0  ;;  %v456_v51 = vld [vmem:[#allocation11 + $0x138] sm:$0xff]  ;;  %v1274_v52 = vpack.c.bf16 %v451_v49, %v449_v48 }
 0x159   :  { %v453_v54 = vld [vmem:[#allocation11 + $0x120] sm:$0xff] }
 0x15a   :  { %v222_v55 = vmax.f32 %v219_v53, 0.0  ;;  %v1276_v53 = vpack.c.bf16 %v456_v51, %v454_v50 }
 0x15c   :  { %1117 = vmatmul.mubr.f32.vlgmr.msra.gmra.mrb[0].mxu1 %v222_v55  ;;  %v455_v55 = vld [vmem:[#allocation11 + $0x130] sm:$0xff] }
 0x15d   :  { %1243 = vmatpush1.bf16.msra.mxu1 %v1242_v4  ;;  %v1278_v56 = vpack.c.bf16 %v455_v55, %v453_v54  ;;  %v1282_v4 = vpack.c.bf16 %v459_v3, %v457_v2  ;;  %v600_v55 = vld [vmem:[#allocation12 + $0x10] sm:$0xff]  ;;  %v621_v3 = vld [vmem:[#allocation12 + $0xb8] sm:$0xff] }
 0x15e   :  { %1245 = vmatprep.subr.bf16.mxu1 %v1244_v5  ;;  %v462_v5 = vld [vmem:[#allocation11 + $0x168] sm:$0xff]  ;;  %v620_v2 = vld [vmem:[#allocation12 + $0xb0] sm:$0xff] }
 0x15f   :  { %v1284_v7 = vpack.c.bf16 %v464_v6, %v462_v5  ;;  %v605_v5 = vld [vmem:[#allocation12 + $0x38] sm:$0xff] }
 0x161   :  { %1247 = vmatpush1.bf16.msra.mxu1 %v1246_v10  ;;  %v1286_v10 = vpack.c.bf16 %v463_v9, %v461_v8  ;;  %v623_v8 = vld [vmem:[#allocation12 + $0xc8] sm:$0xff] }
 0x162   :  { %1249 = vmatprep.subr.bf16.mxu1 %v1248_v11  ;;  %v466_v11 = vld [vmem:[#allocation11 + $0x188] sm:$0xff] }
 0x163   :  { %v1288_v13 = vpack.c.bf16 %v468_v12, %v466_v11  ;;  %v607_v11 = vld [vmem:[#allocation12 + $0x48] sm:$0xff] }
 0x165   :  { %1251 = vmatpush1.bf16.msra.mxu1 %v1250_v16  ;;  %v1290_v16 = vpack.c.bf16 %v467_v15, %v465_v14  ;;  %v625_v14 = vld [vmem:[#allocation12 + $0xd8] sm:$0xff] }
 0x166   :  { %1253 = vmatprep.subr.bf16.mxu1 %v1252_v17  ;;  %v470_v17 = vld [vmem:[#allocation11 + $0x1a8] sm:$0xff] }
 0x167   :  { %v1292_v19 = vpack.c.bf16 %v472_v18, %v470_v17  ;;  %v609_v17 = vld [vmem:[#allocation12 + $0x58] sm:$0xff] }
 0x169   :  { %1255 = vmatpush1.bf16.msra.mxu1 %v1254_v22  ;;  %v1294_v22 = vpack.c.bf16 %v471_v21, %v469_v20  ;;  %v627_v20 = vld [vmem:[#allocation12 + $0xe8] sm:$0xff]  ;;  %v610_v21 = vld [vmem:[#allocation12 + $0x60] sm:$0xff] }
 0x16a   :  { %1257 = vmatprep.subr.bf16.mxu1 %v1256_v23  ;;  %v474_v23 = vld [vmem:[#allocation11 + $0x1c8] sm:$0xff] }
 0x16b   :  { %v1296_v26 = vpack.c.bf16 %v476_v24, %v474_v23  ;;  %v611_v23 = vld [vmem:[#allocation12 + $0x68] sm:$0xff]  ;;  %v628_v24 = vld [vmem:[#allocation12 + $0xf0] sm:$0xff] }
 0x16c   :  { %v1332_v27 = vpack.c.bf16 %v629_v25, %v628_v24  ;;  %v655_v24 = vld [vmem:[#allocation12 + $0x1c8] sm:$0xff] }
 0x16d   :  { %1259 = vmatpush1.bf16.msra.mxu1 %v1258_v28  ;;  %v478_v28 = vld [vmem:[#allocation11 + $0x1e8] sm:$0xff] }
 0x16e   :  { %1261 = vmatprep.subr.bf16.mxu1 %v1260_v29  ;;  %v480_v29 = vld [vmem:[#allocation11 + $0x1f8] sm:$0xff] }
 0x16f   :  { %v1300_v31 = vpack.c.bf16 %v480_v29, %v478_v28  ;;  %v612_v28 = vld [vmem:[#allocation12 + $0x70] sm:$0xff]  ;;  %v613_v29 = vld [vmem:[#allocation12 + $0x78] sm:$0xff] }
 0x171   :  { %1263 = vmatpush1.bf16.msra.mxu1 %v1262_v34  ;;  %v1302_v34 = vpack.c.bf16 %v479_v33, %v477_v32  ;;  %v647_v32 = vld [vmem:[#allocation12 + $0x188] sm:$0xff] }
 0x172   :  { %1265 = vmatprep.subr.bf16.mxu1 %v1264_v35  ;;  %v614_v35 = vld [vmem:[#allocation12 + $0x80] sm:$0xff] }
 0x173   :  { %v1304_v38 = vpack.c.bf16 %v615_v36, %v614_v35 }
 0x175   :  { %1267 = vmatpush1.bf16.msra.mxu1 %v1266_v40  ;;  %v1306_v40 = vpack.c.bf16 %v599_v39, %v598_v37  ;;  %1305 = vmatprep.subr.bf16.mxu0 %v1304_v38  ;;  %v481_v37 = vld [vmem:[%s1853_s8] sm:$0x3] }
 0x176   :  { %1269 = vmatprep.subr.bf16.mxu1 %v1268_v41  ;;  %v948_v41 = vld [vmem:[%s1851_s6] ss:$0 sm:$0xff] }
 0x179   :  { %1271 = vmatpush1.bf16.msra.mxu1 %v1270_v46 }
 0x17a   :  { %1273 = vmatprep.subr.bf16.mxu1 %v1272_v47 }
 0x17d   :  { %1275 = vmatpush1.bf16.msra.mxu1 %v1274_v52  ;;  %v616_v52 = vld [vmem:[#allocation12 + $0x90] sm:$0xff] }
 0x17e   :  { %1277 = vmatprep.subr.bf16.mxu1 %v1276_v53  ;;  %v617_v53 = vld [vmem:[#allocation12 + $0x98] sm:$0xff] }
 0x17f   :  { %v1308_v54 = vpack.c.bf16 %v617_v53, %v616_v52 }
 0x181   :  { %1279 = vmatpush1.bf16.msra.mxu1 %v1278_v56  ;;  %v601_v56 = vld [vmem:[#allocation12 + $0x18] sm:$0xff] }
 0x182   :  { %1281 = vmatprep.subr.bf16.mxu1 %v1280_v63  ;;  %v1314_v63 = vpack.c.bf16 %v603_v62, %v602_v61  ;;  %v630_v61 = vld [vmem:[#allocation12 + $0x100] sm:$0xff]  ;;  %v631_v62 = vld [vmem:[#allocation12 + $0x108] sm:$0xff] }
 0x185   :  { %1283 = vmatpush1.bf16.msra.mxu1 %v1282_v4  ;;  %v1316_v4 = vpack.c.bf16 %v621_v3, %v620_v2  ;;  %v648_v3 = vld [vmem:[#allocation12 + $0x190] sm:$0xff] }
 0x186   :  { %1285 = vmatprep.subr.bf16.mxu1 %v1284_v7  ;;  %v622_v7 = vld [vmem:[#allocation12 + $0xc0] sm:$0xff] }
 0x187   :  { %v1320_v9 = vpack.c.bf16 %v623_v8, %v622_v7  ;;  %v632_v8 = vld [vmem:[#allocation12 + $0x110] sm:$0xff] }
 0x189   :  { %1287 = vmatpush1.bf16.msra.mxu1 %v1286_v10  ;;  %v606_v10 = vld [vmem:[#allocation12 + $0x40] sm:$0xff] }
 0x18a   :  { %1289 = vmatprep.subr.bf16.mxu1 %v1288_v13  ;;  %v1322_v12 = vpack.c.bf16 %v607_v11, %v606_v10  ;;  %v624_v13 = vld [vmem:[#allocation12 + $0xd0] sm:$0xff]  ;;  %v650_v11 = vld [vmem:[#allocation12 + $0x1a0] sm:$0xff] }
 0x18b   :  { %v1324_v15 = vpack.c.bf16 %v625_v14, %v624_v13 }
 0x18d   :  { %1291 = vmatpush1.bf16.msra.mxu1 %v1290_v16  ;;  %v608_v16 = vld [vmem:[#allocation12 + $0x50] sm:$0xff] }
 0x18e   :  { %1293 = vmatprep.subr.bf16.mxu1 %v1292_v19  ;;  %v1326_v18 = vpack.c.bf16 %v609_v17, %v608_v16  ;;  %v626_v19 = vld [vmem:[#allocation12 + $0xe0] sm:$0xff]  ;;  %v635_v16 = vld [vmem:[#allocation12 + $0x128] sm:$0xff]  ;;  %v652_v17 = vld [vmem:[#allocation12 + $0x1b0] sm:$0xff] }
 0x191   :  { %1295 = vmatpush1.bf16.msra.mxu1 %v1294_v22  ;;  %v1328_v22 = vpack.c.bf16 %v627_v20, %v626_v19 }
 0x192   :  { %1297 = vmatprep.subr.bf16.mxu1 %v1296_v26  ;;  %v1330_v26 = vpack.c.bf16 %v611_v23, %v610_v21  ;;  %v636_v21 = vld [vmem:[#allocation12 + $0x130] sm:$0xff]  ;;  %v654_v23 = vld [vmem:[#allocation12 + $0x1c0] sm:$0xff] }
 0x195   :  { %1299 = vmatpush1.bf16.msra.mxu1 %v1298_v30  ;;  %v1334_v30 = vpack.c.bf16 %v613_v29, %v612_v28  ;;  %v639_v28 = vld [vmem:[#allocation12 + $0x148] sm:$0xff]  ;;  %v656_v29 = vld [vmem:[#allocation12 + $0x1d0] sm:$0xff] }
 0x196   :  { %1301 = vmatprep.subr.bf16.mxu1 %v1300_v31  ;;  %v646_v31 = vld [vmem:[#allocation12 + $0x180] sm:$0xff] }
 0x197   :  { %v1336_v33 = vpack.c.bf16 %v647_v32, %v646_v31 }
 0x199   :  { %1303 = vmatpush1.bf16.msra.mxu1 %v1302_v34  ;;  %v483_v34 = vlaneseq }
 0x19a   :  { %1368 = vmatprep.subr.bf16.mxu1 %v1608_v0 }
 0x19b   :  { %v484_v35 = vshrl.u32 %v483_v34, 7  ;;  %v641_v34 = vld [vmem:[#allocation12 + $0x158] sm:$0xff] }
 0x19d   :  { %v485_v36 = vsub.s32 0, %v484_v35  ;;  %v489_v38 = vsub.s32 1, %v484_v35 }
 0x19f   :  { %v486_v39 = vrot.slane %v481_v37, %v485_v36  ;;  %v659_v36 = vld [vmem:[#allocation12 + $0x1e8] sm:$0xff] }
 0x22f   :  { %v312_v58 = vpop.f32.mrb[0].mxu1 }
 0x230   :  { %v313_v59 = vadd.f32 %v947_v57, %v312_v58  ;;  %v1118_v60 = vpop.f32.mrb[1].mxu1  ;;  %v1310_v57 = vpack.c.bf16 %v601_v56, %v600_v55  ;;  %v618_v58 = vld [vmem:[#allocation12 + $0xa0] sm:$0xff]  ;;  %v1611_v55 = vmov 1983009808  }
 0x231   :  { %v672_v56 = vunpack.c.l.s4 %v1611_v55  ;;  %v837_v55 = vld [vmem:[#allocation14 + $0x28] sm:$0xff] }
 0x232   :  { %316 = vst [vmem:[#allocation2] sm:$0x3] %v313_v59  ;;  %1152 = vmatmul.mubr.f32.vlgmr.msra.gmra.mrb[2].mxu0 %v313_v59  ;;  %v619_v59 = vld [vmem:[#allocation12 + $0xa8] sm:$0xff] }
 0x233   :  { %1307 = vmatpush3.bf16.msra.mxu0 %v1306_v40  ;;  %v1312_v60 = vpack.c.bf16 %v619_v59, %v618_v58  ;;  %v490_v40 = vrot.slane %v481_v37, %v489_v38  ;;  %v673_v58 = vunpack.c.0.s8 %v672_v56 }
 0x234   :  { %1309 = vmatprep.subr.bf16.mxu0 %v1308_v54 }
 0x235   :  { %v676_v59 = vsub.s32 %v673_v58, %v484_v35  ;;  %v658_v35 = vld [vmem:[#allocation12 + $0x1e0] sm:$0xff]  ;;  %v839_v58 = vld [vmem:[#allocation14 + $0x38] sm:$0xff] }
 0x236   :  { %v1360_v38 = vpack.c.bf16 %v659_v36, %v658_v35 }
 0x237   :  { %1311 = vmatpush3.bf16.msra.mxu0 %v1310_v57 }
 0x238   :  { %1313 = vmatprep.subr.bf16.mxu0 %v1312_v60 }
 0x23b   :  { %1315 = vmatpush3.bf16.msra.mxu0 %v1314_v63 }
 0x23c   :  { %1317 = vmatprep.subr.bf16.mxu0 %v1316_v4  ;;  %v649_v4 = vld [vmem:[#allocation12 + $0x198] sm:$0xff] }
 0x23d   :  { %v1340_v7 = vpack.c.bf16 %v649_v4, %v648_v3  ;;  %v844_v4 = vld [vmem:[#allocation14 + $0x60] sm:$0xff] }
 0x305   :  { %v406_v42 = vpop.f32.mrb[2].mxu0 }
 0x306   :  { %v407_v43 = vadd.f32 %v948_v41, %v406_v42  ;;  %v1153_v44 = vpop.f32.mrb[3].mxu0 }
 0x308   :  { %v410_v45 = vadd.f32 3.0, %v407_v43 }
 0x30a   :  { %v411_v46 = vmax.f32 %v410_v45, 0.0 }
 0x30c   :  { %v412_v47 = vmin.f32 %v411_v46, 6.0 }
 0x30e   :  { %v413_v48 = vmul.f32 %v412_v47, %v407_v43 }
 0x310   :  { %v414_v49 = vmul.f32 0.16666667, %v413_v48 }
 0x312   :  { %415 = vst [vmem:[#allocation2 + $0x2] sm:$0x3] %v414_v49 }
 0x319   :  { %v949_v50 = vld.sshfl [vmem:[#allocation2] sm:$0x33 pattern:$0x76325410] }
 0x31a   :  { %v501_v51 = vcombine.high %v949_v50, %v949_v50 }
 0x31c   :  { %568 = vmatprep.mubr.f32.mxu1 %v501_v51 }
 0x31d   :  { %569 = vmatmul.mubr.f32.vlgmr.msra.gmra.mrb[2].mxu1 %v949_v50 }
 0x31e   :  { %1186 = vmatprep.mubr.msk.f32.mxu1 %vm1609_vm0, %v1610_v1  ;;  %v604_v1 = vld [vmem:[#allocation12 + $0x30] sm:$0xff] }
 0x31f   :  { %v1318_v6 = vpack.c.bf16 %v605_v5, %v604_v1  ;;  %v1338_v5 = vpack.c.bf16 %v631_v62, %v630_v61  ;;  %v841_v61 = vld [vmem:[#allocation14 + $0x48] sm:$0xff] }
 0x321   :  { %1319 = vmatpush3.bf16.msra.mxu0 %v1318_v6 }
 0x322   :  { %1321 = vmatprep.subr.bf16.mxu0 %v1320_v9  ;;  %v633_v9 = vld [vmem:[#allocation12 + $0x118] sm:$0xff] }
 0x323   :  { %v1342_v13 = vpack.c.bf16 %v633_v9, %v632_v8 }
 0x325   :  { %1323 = vmatpush3.bf16.msra.mxu0 %v1322_v12  ;;  %v651_v12 = vld [vmem:[#allocation12 + $0x1a8] sm:$0xff] }
 0x326   :  { %1325 = vmatprep.subr.bf16.mxu0 %v1324_v15  ;;  %v1344_v14 = vpack.c.bf16 %v651_v12, %v650_v11  ;;  %v634_v15 = vld [vmem:[#allocation12 + $0x120] sm:$0xff] }
 0x327   :  { %v1346_v19 = vpack.c.bf16 %v635_v16, %v634_v15  ;;  %v951_v12 = vld [vmem:[%s1855_s10] ss:$0 sm:$0xff]  ;;  %s1565_s10 = scalar_lea.vmem %s934_s1, 32 }
 0x328   :  { %p1566_p0 = scmp.ne.s32.totalorder %s934_s1, %s1565_s10  ;;  %p1571_p2 = scmp.lt.s32.totalorder %s1565_s10, %s1565_s10 }
 0x329   :  { %1327 = vmatpush3.bf16.msra.mxu0 %v1326_v18  ;;  %v653_v18 = vld [vmem:[#allocation12 + $0x1b8] sm:$0xff] }
 0x32a   :  { %1329 = vmatprep.subr.bf16.mxu0 %v1328_v22  ;;  %v1348_v20 = vpack.c.bf16 %v653_v18, %v652_v17  ;;  %v637_v22 = vld [vmem:[#allocation12 + $0x138] sm:$0xff]  ;;  %p1572_p3 = por %p1571_p2, %p1570_p1 }
 0x32b   :  { %v1350_v25 = vpack.c.bf16 %v637_v22, %v636_v21 }
 0x32c   :  { %p1573_p4 = pnand %p1572_p3, %p1566_p0 }
 0x32d   :  { %1331 = vmatpush3.bf16.msra.mxu0 %v1330_v26  ;;  %v1352_v26 = vpack.c.bf16 %v655_v24, %v654_v23 }
 0x32e   :  { %1333 = vmatprep.subr.bf16.mxu0 %v1332_v27  ;;  %v638_v27 = vld [vmem:[#allocation12 + $0x140] sm:$0xff] }
 0x32f   :  { %v1354_v31 = vpack.c.bf16 %v639_v28, %v638_v27 }
 0x331   :  { %1335 = vmatpush3.bf16.msra.mxu0 %v1334_v30  ;;  %v657_v30 = vld [vmem:[#allocation12 + $0x1d8] sm:$0xff] }
 0x332   :  { %1337 = vmatprep.subr.bf16.mxu0 %v1336_v33  ;;  %v1356_v32 = vpack.c.bf16 %v657_v30, %v656_v29  ;;  %v640_v33 = vld [vmem:[#allocation12 + $0x150] sm:$0xff] }
 0x333   :  { %v1358_v37 = vpack.c.bf16 %v641_v34, %v640_v33 }
 0x3f0   :  { %v570_v41 = vpop.f32.mrb[2].mxu1 }
 0x3f1   :  { %v571_v42 = vadd.f32 %v570_v41, %v486_v39  ;;  %v572_v43 = vpop.f32.mrb[3].mxu1  ;;  %v642_v39 = vld [vmem:[#allocation12 + $0x160] sm:$0xff]  ;;  %v660_v41 = vld [vmem:[#allocation12 + $0x1f0] sm:$0xff] }
 0x3f2   :  { %v573_v44 = vadd.f32 %v572_v43, %v490_v40  ;;  %v643_v40 = vld [vmem:[#allocation12 + $0x168] sm:$0xff] }
 0x3f3   :  { %v575_v45 = vadd.f32 3.0, %v571_v42  ;;  %v1362_v43 = vpack.c.bf16 %v643_v40, %v642_v39 }
 0x3f4   :  { %v576_v46 = vadd.f32 3.0, %v573_v44 }
 0x3f5   :  { %v577_v47 = vmax.f32 %v575_v45, 0.0  ;;  %v644_v45 = vld [vmem:[#allocation12 + $0x170] sm:$0xff] }
 0x3f6   :  { %v578_v48 = vmax.f32 %v576_v46, 0.0  ;;  %v645_v46 = vld [vmem:[#allocation12 + $0x178] sm:$0xff] }
 0x3f7   :  { %v579_v49 = vmin.f32 %v577_v47, 6.0  ;;  %v1366_v47 = vpack.c.bf16 %v645_v46, %v644_v45 }
 0x3f8   :  { %v580_v50 = vmin.f32 %v578_v48, 6.0  ;;  %v832_v48 = vld [vmem:[#allocation14] sm:$0xff] }
 0x3f9   :  { %v581_v51 = vmul.f32 %v579_v49, %v571_v42  ;;  %v661_v42 = vld [vmem:[#allocation12 + $0x1f8] sm:$0xff]  ;;  %v833_v49 = vld [vmem:[#allocation14 + $0x8] sm:$0xff] }
 0x3fa   :  { %v582_v52 = vmul.f32 %v580_v50, %v573_v44  ;;  %v1364_v44 = vpack.c.bf16 %v661_v42, %v660_v41  ;;  %v834_v50 = vld [vmem:[#allocation14 + $0x10] sm:$0xff] }
 0x3fb   :  { %v583_v53 = vmul.f32 0.16666667, %v581_v51  ;;  %v1369_v51 = vpack.c.bf16 %v833_v49, %v832_v48 }
 0x3fc   :  { %v584_v54 = vmul.f32 0.16666667, %v582_v52  ;;  %v835_v52 = vld [vmem:[#allocation14 + $0x18] sm:$0xff] }
 0x3fd   :  { %1370 = vmatpush3.bf16.msra.mxu1 %v1369_v51 }
 0x3fe   :  { %v587_v57 = vcombine.low %v583_v53, %v584_v54  ;;  %v1372_v53 = vpack.c.bf16 %v835_v52, %v834_v50  ;;  %1371 = vmatprep.subr.bf16.mxu1 %v1608_v0  ;;  %v836_v54 = vld [vmem:[#allocation14 + $0x20] sm:$0xff] }
 0x3ff   :  { %v1375_v56 = vpack.c.bf16 %v837_v55, %v836_v54 }
 0x400   :  { %950 = vst.sshfl [vmem:[#allocation2 + $0x4] sm:$0x33 pattern:$0x76325410] %v587_v57  ;;  %v838_v57 = vld [vmem:[#allocation14 + $0x30] sm:$0xff] }
 0x401   :  { %1373 = vmatpush3.bf16.msra.mxu1 %v1372_v53 }
 0x402   :  { %1374 = vmatprep.subr.bf16.mxu1 %v1608_v0 }
 0x405   :  { %1376 = vmatpush3.bf16.msra.mxu1 %v1375_v56 }
 0x406   :  { %1377 = vmatprep.subr.bf16.mxu1 %v1608_v0 }
 0x407   :  { %v597_v60 = vld [vmem:[#allocation2] sm:$0xff] }
 0x408   :  { %v677_v63 = vrot.slane %v597_v60, %v676_v59  ;;  %v670_v2 = vcombine.high %v597_v60, %v597_v60  ;;  %v840_v60 = vld [vmem:[#allocation14 + $0x40] sm:$0xff] }
 0x409   :  { %v1381_v62 = vpack.c.bf16 %v841_v61, %v840_v60 }
 0x40a   :  { %v685_v1 = vcombine.high %v677_v63, %v677_v63  ;;  %v684_v6 = vrot.slane %v670_v2, %v676_v59  ;;  %v1378_v59 = vpack.c.bf16 %v839_v58, %v838_v57  ;;  %v843_v2 = vld [vmem:[#allocation14 + $0x58] sm:$0xff] }
 0x40c   :  { %755 = vmatprep.mubr.f32.mxu0 %v685_v1  ;;  %v686_v10 = vcombine.high %v684_v6, %v684_v6  ;;  %1379 = vmatpush3.bf16.msra.mxu1 %v1378_v59  ;;  %v845_v1 = vld [vmem:[#allocation14 + $0x68] sm:$0xff] }
 0x40d   :  { %756 = vmatmul.mubr.f32.vlgmr.msra.gmra.mrb[4].mxu0 %v677_v63  ;;  %1380 = vmatprep.subr.bf16.mxu1 %v1608_v0  ;;  %v842_v63 = vld [vmem:[#allocation14 + $0x50] sm:$0xff] }
 0x40e   :  { %1339 = vmatpush3.bf16.msra.mxu0 %v1338_v5  ;;  %825 = vmatprep.mubr.f32.mxu0 %v686_v10  ;;  %v1384_v3 = vpack.c.bf16 %v843_v2, %v842_v63  ;;  %v1387_v5 = vpack.c.bf16 %v845_v1, %v844_v4 }
 0x40f   :  { %1341 = vmatprep.subr.bf16.mxu0 %v1340_v7  ;;  %v847_v7 = vld [vmem:[#allocation14 + $0x78] sm:$0xff] }
 0x410   :  { %1382 = vmatpush3.bf16.msra.mxu1 %v1381_v62 }
 0x411   :  { %1383 = vmatprep.subr.bf16.mxu1 %v1608_v0 }
 0x412   :  { %1343 = vmatpush3.bf16.msra.mxu0 %v1342_v13 }
 0x413   :  { %1345 = vmatprep.subr.bf16.mxu0 %v1344_v14 }
 0x414   :  { %1385 = vmatpush3.bf16.msra.mxu1 %v1384_v3 }
 0x415   :  { %1386 = vmatprep.subr.bf16.mxu1 %v1608_v0 }
 0x416   :  { %1347 = vmatpush3.bf16.msra.mxu0 %v1346_v19 }
 0x417   :  { %1349 = vmatprep.subr.bf16.mxu0 %v1348_v20 }
 0x418   :  { %1388 = vmatpush3.bf16.msra.mxu1 %v1387_v5 }
 0x419   :  { %1389 = vmatprep.subr.bf16.mxu1 %v1608_v0  ;;  %v952_v0 = vld [vmem:[%s1857_s12] ss:$0 sm:$0xff] }
 0x41a   :  { %1351 = vmatpush3.bf16.msra.mxu0 %v1350_v25 }
 0x41b   :  { %1353 = vmatprep.subr.bf16.mxu0 %v1352_v26 }
 0x41e   :  { %1355 = vmatpush3.bf16.msra.mxu0 %v1354_v31 }
 0x41f   :  { %1357 = vmatprep.subr.bf16.mxu0 %v1356_v32 }
 0x422   :  { %1359 = vmatpush3.bf16.msra.mxu0 %v1358_v37 }
 0x423   :  { %1361 = vmatprep.subr.bf16.mxu0 %v1360_v38 }
 0x426   :  { %1363 = vmatpush3.bf16.msra.mxu0 %v1362_v43 }
 0x427   :  { %1365 = vmatprep.subr.bf16.mxu0 %v1364_v44 }
 0x42a   :  { %1367 = vmatpush3.bf16.msra.mxu0 %v1366_v47 }
 0x42d   :  { %826 = vmatmul.mubr.f32.vlgmr.msra.gmra.mrb[6].mxu0 %v684_v6  ;;  %v846_v6 = vld [vmem:[#allocation14 + $0x70] sm:$0xff] }
 0x42e   :  { %v1390_v8 = vpack.c.bf16 %v847_v7, %v846_v6 }
 0x430   :  { %1391 = vmatpush3.bf16.msra.mxu1 %v1390_v8 }
 0x4e0   :  { %v1022_v9 = vpop.f32.mrb[4].mxu0 }
 0x4e1   :  { %v1023_v10 = vpop.f32.mrb[5].mxu0 }
 0x4e2   :  { %v1024_v11 = vadd.f32 %v1023_v10, %v1022_v9 }
 0x4e4   :  { %v758_v15 = vadd.f32 %v1024_v11, %v951_v12 }
 0x500   :  { %v1057_v13 = vpop.f32.mrb[6].mxu0 }
 0x501   :  { %v1058_v14 = vpop.f32.mrb[7].mxu0 }
 0x502   :  { %v1059_v16 = vadd.f32 %v1058_v14, %v1057_v13 }
 0x504   :  { %v828_v17 = vadd.f32 %v1059_v16, %v758_v15 }
 0x506   :  { %v831_v18 = vmax.f32 %v828_v17, 0.0 }
 0x508   :  { %1187 = vmatmul.mubr.f32.vlgmr.msra.gmra.mrb[4].mxu1 %v831_v18 }
 0x5db   :  { %v921_v19 = vpop.f32.mrb[4].mxu1 }
 0x5dc   :  { %v922_v20 = vadd.f32 %v952_v0, %v921_v19  ;;  %v1188_v21 = vpop.f32.mrb[5].mxu1 }
 0x5de   :  { %1409 = vtanh.f32 %v922_v20 }
 0x5e8   :  { %v1410_v22 = vpop.eup %1409 }
 0x5e9   :  { %926 = vst [vmem:[#allocation15] sm:$0x3] %v1410_v22 }
 0x5ea   :  { %1576 = shalt.err (!%p1573_p4)
}
 0x5eb   :  { %s1577_s12 = scalar_lea.hbm %s1858_s13, 32 }
 0x5ec   :  { %p1578_p5 = scmp.ne.s32.totalorder %s1858_s13, %s1577_s12  ;;  %p1581_p6 = scmp.lt.u32.totalorder %s1577_s12, %s1858_s13 }
 0x5ee   :  { %p1583_p7 = pnand %p1581_p6, %p1578_p5 }
 0x5f0   :  { %1586 = shalt.err (!%p1583_p7)
}
 0x5f1   :  { %936 = dma.vmem_to_hbm [thread:$0]  %s934_s1, 32, %s1858_s13, [#allocation5]  }
 0x5f2   :  { %1595 = dma.done.wait [#allocation5], 32  }
 0x5f3   :  { %1596 = vsyncadd [#allocation5], 4294967264 }
 0x5f4   :  { %940 = vsyncpa [#allocation4], 1 }
 0x5f5   :  { %941 = vsyncpa [#allocation7], 1 }
 0x5f6   :  { %942 = vsyncpa [#allocation10], 1 }
 0x5f7   :  { %943 = vsyncpa [#allocation13], 1 }
 0x5f8   :  { %944 = vsyncpa [#allocation5], 1 }

</bundles_post_ra>
